<compile_context>
chip_gen: v6e
topology: v6e:2x2x1
jax: 0.10.0
libtpu: 0.0.40
codegen_flags: <defaults>
</compile_context>

<pallas_src>
import math

import numpy as np
import jax
import jax.numpy as jnp
from jax.experimental import pallas as pl
from jax.experimental.pallas import tpu as pltpu

F32 = jnp.float32


# ----------------------------- small helpers ---------------------------------------------

def _full_spec(shape):
    """BlockSpec covering the whole array (single grid step)."""
    nd = len(shape)
    return pl.BlockSpec(shape, lambda i, _nd=nd: (0,) * _nd)


def _roll_rows(y, shift):
    """Circular roll of rows (axis 0) by a static +/-1 shift: result[l] = y[(l - shift) % L]."""
    if shift == 1:
        return jnp.concatenate([y[-1:], y[:-1]], axis=0)
    if shift == -1:
        return jnp.concatenate([y[1:], y[:1]], axis=0)
    raise ValueError(shift)


def _activation(x, name):
    if name == "gelu":
        return jax.nn.gelu(x)
    return jnp.maximum(x, 0.0)


# ----------------------------- shared decoder-layer tail math ----------------------------

def _layer_tail(v, h, t1, t2, A_big, wo, bo, wff1, wff2, wtrend, B, L, C, act):
    """Decoder-layer tail on whole-batch (B*L, .) slabs:
         attn-out proj + residual, series_decomp1, 1x1-conv FFN, series_decomp2,
         shared circular(k=3) trend-projection conv (both residual trends stacked into one
         matmul) and trend accumulation."""
    attn = jnp.dot(v, wo, preferred_element_type=F32) + bo            # (BL, D)
    x1 = h + attn
    mm1 = jnp.dot(A_big, x1, preferred_element_type=F32)              # per-batch moving avg
    s1 = x1 - mm1                                                     # seasonal 1
    ff = _activation(jnp.dot(s1, wff1, preferred_element_type=F32), act)
    x2 = s1 + jnp.dot(ff, wff2, preferred_element_type=F32)
    mm2 = jnp.dot(A_big, x2, preferred_element_type=F32)
    s2 = x2 - mm2                                                     # seasonal output

    BL = B * L
    # Both trend residuals through the circular projection conv in ONE matmul.
    tp = jnp.dot(jnp.concatenate([mm1, mm2], axis=0), wtrend,
                 preferred_element_type=F32)                          # (2*BL, 3C)

    def cconv(rows):                                                  # (L, 3C) -> (L, C)
        return (_roll_rows(rows[:, :C], 1)
                + rows[:, C:2 * C]
                + _roll_rows(rows[:, 2 * C:], -1))

    t1n = jnp.concatenate(
        [t1[b * L:(b + 1) * L] + cconv(tp[b * L:(b + 1) * L]) for b in range(B)], axis=0)
    t2n = jnp.concatenate(
        [t2[b * L:(b + 1) * L] + cconv(tp[BL + b * L:BL + (b + 1) * L]) for b in range(B)],
        axis=0)
    return s2, t1n, t2n


# ----------------------------- kernel 1: stem (l1 + embedding + QKV) ---------------------

def _make_stem_call(B, L, D, latent):
    BL = B * L

    def kernel(x_ref, w1_ref, b1_ref, wemb_ref, wqkv_ref, bqkv_ref, h_ref, qkv_ref):
        wemb = wemb_ref[...]                                          # (D, 3D) [prev|cent|next]
        wqkv = wqkv_ref[...]                                          # (D, 3D) [Wq|Wk|Wv]
        bqkv = bqkv_ref[...]                                          # (1, 3D)
        for b in range(B):
            # l1: h0 = x[b] @ W1 + b1 directly in (L, D) layout — weighted sum of the
            # per-latent-unit (L, D) weight slabs, scalars read from SMEM.
            h0 = b1_ref[...]
            for k in range(latent):
                h0 = h0 + x_ref[b, k] * w1_ref[k]
            # TokenEmbedding: circular Conv1d(D, D, k=3, pad=1, circular, no bias),
            # channel-last: one widened channel matmul + two row rolls.
            y = jnp.dot(h0, wemb, preferred_element_type=F32)         # (L, 3D)
            h1 = (_roll_rows(y[:, :D], 1) + y[:, D:2 * D] + _roll_rows(y[:, 2 * D:], -1))
            h_ref[b * L:(b + 1) * L, :] = h1
            qkv_ref[b * L:(b + 1) * L, :] = (
                jnp.dot(h1, wqkv, preferred_element_type=F32) + bqkv)

    def call(x, w1, b1, wemb, wqkv, bqkv):
        return pl.pallas_call(
            kernel,
            out_shape=(jax.ShapeDtypeStruct((BL, D), F32),
                       jax.ShapeDtypeStruct((BL, 3 * D), F32)),
            grid=(1,),
            in_specs=[pl.BlockSpec(memory_space=pltpu.MemorySpace.SMEM),   # x as SMEM scalars
                      _full_spec(w1.shape), _full_spec(b1.shape), _full_spec(wemb.shape),
                      _full_spec(wqkv.shape), _full_spec(bqkv.shape)],
            out_specs=(_full_spec((BL, D)), _full_spec((BL, 3 * D))),
        )(x, w1, b1, wemb, wqkv, bqkv)

    return call


# ----------------------------- kernel 2a: mid decoder layer (only if d_layers > 1) -------

def _make_mid_layer_call(B, L, D, C, act):
    BL = B * L

    def kernel(v_ref, h_ref, t1_ref, t2_ref, A_ref,
               wo_ref, bo_ref, wff1_ref, wff2_ref, wtr_ref,
               wqkv_ref, bqkv_ref,
               hout_ref, t1out_ref, t2out_ref, qkvout_ref):
        s2, t1n, t2n = _layer_tail(
            v_ref[...], h_ref[...], t1_ref[...], t2_ref[...], A_ref[...],
            wo_ref[...], bo_ref[...], wff1_ref[...], wff2_ref[...], wtr_ref[...],
            B, L, C, act)
        hout_ref[...] = s2
        t1out_ref[...] = t1n
        t2out_ref[...] = t2n
        # Next layer's fused QKV projection, fused here so no extra launch is needed.
        qkvout_ref[...] = (jnp.dot(s2, wqkv_ref[...], preferred_element_type=F32)
                           + bqkv_ref[...])

    def call(V, h, t1, t2, A_big, lp, lp_next):
        args = (V, h, t1, t2, A_big,
                lp['wo'], lp['bo'], lp['w_ff1'], lp['w_ff2'], lp['w_trend'],
                lp_next['wqkv'], lp_next['bqkv'])
        D3 = lp_next['wqkv'].shape[1]
        return pl.pallas_call(
            kernel,
            out_shape=(jax.ShapeDtypeStruct((BL, D), F32),
                       jax.ShapeDtypeStruct((BL, C), F32),
                       jax.ShapeDtypeStruct((BL, C), F32),
                       jax.ShapeDtypeStruct((BL, D3), F32)),
            grid=(1,),
            in_specs=[_full_spec(a.shape) for a in args],
            out_specs=(_full_spec((BL, D)), _full_spec((BL, C)),
                       _full_spec((BL, C)), _full_spec((BL, D3))),
        )(*args)

    return call


# ----------------------------- kernel 2b: last decoder layer + norm + proj + SE fusion ---

def _make_last_layer_call(B, L, C, act):
    BL = B * L

    def kernel(v_ref, h_ref, t1_ref, t2_ref, A_ref,
               wo_ref, bo_ref, wff1_ref, wff2_ref, wtr_ref,
               g_ref, be_ref, pw_ref, pb_ref,
               aw1_ref, ab1_ref, aw2_ref, ab2_ref,
               bw1_ref, bb1_ref, bw2_ref, bb2_ref,
               out_ref):
        s2, t1n, t2n = _layer_tail(
            v_ref[...], h_ref[...], t1_ref[...], t2_ref[...], A_ref[...],
            wo_ref[...], bo_ref[...], wff1_ref[...], wff2_ref[...], wtr_ref[...],
            B, L, C, act)

        # my_Layernorm: standard LayerNorm over D, then subtract the per-sequence mean.
        mu = jnp.mean(s2, axis=-1, keepdims=True)
        var = jnp.mean((s2 - mu) ** 2, axis=-1, keepdims=True)
        xh = (s2 - mu) * jax.lax.rsqrt(var + 1e-5) * g_ref[...] + be_ref[...]
        xh = jnp.concatenate(
            [xh[b * L:(b + 1) * L] - jnp.mean(xh[b * L:(b + 1) * L], axis=0, keepdims=True)
             for b in range(B)], axis=0)
        seasonal = jnp.dot(xh, pw_ref[...], preferred_element_type=F32) + pb_ref[...]  # (BL,C)

        # SqueezeAndExciteFusionAdd on the two trend streams (per-sequence global pool over L,
        # fc -> relu -> fc -> sigmoid gate, applied channel-last; transposes cancel).
        def pooled(t):
            return jnp.concatenate(
                [jnp.mean(t[b * L:(b + 1) * L], axis=0, keepdims=True) for b in range(B)],
                axis=0)                                                # (B, C)

        def gates(p, w1, b1, w2, b2):
            hdn = jnp.maximum(jnp.dot(p, w1, preferred_element_type=F32) + b1, 0.0)
            return jax.nn.sigmoid(jnp.dot(hdn, w2, preferred_element_type=F32) + b2)

        ga = gates(pooled(t1n), aw1_ref[...], ab1_ref[...], aw2_ref[...], ab2_ref[...])
        gb = gates(pooled(t2n), bw1_ref[...], bb1_ref[...], bw2_ref[...], bb2_ref[...])

        out_ref[...] = jnp.concatenate(
            [seasonal[b * L:(b + 1) * L]
             + t1n[b * L:(b + 1) * L] * ga[b:b + 1]
             + t2n[b * L:(b + 1) * L] * gb[b:b + 1]
             for b in range(B)], axis=0)

    def call(V, h, t1, t2, A_big, lp, params):
        fp = params['fusion']
        args = (V, h, t1, t2, A_big,
                lp['wo'], lp['bo'], lp['w_ff1'], lp['w_ff2'], lp['w_trend'],
                params['ln_gamma'], params['ln_beta'], params['proj_w'], params['proj_b'],
                fp['a_w1'], fp['a_b1'], fp['a_w2'], fp['a_b2'],
                fp['b_w1'], fp['b_b1'], fp['b_w2'], fp['b_b2'])
        return pl.pallas_call(
            kernel,
            out_shape=jax.ShapeDtypeStruct((BL, C), F32),
            grid=(1,),
            in_specs=[_full_spec(a.shape) for a in args],
            out_specs=_full_spec((BL, C)),
        )(*args)

    return call


# ----------------------------- JAX glue: FFT autocorrelation (eval path) -----------------

def time_delay_agg_inference(values, corr, factor):
    """AutoCorrelation time-delay aggregation (inference path).  values, corr: (B,H,E,L)."""
    B, H, E, L = values.shape
    top_k = int(factor * math.log(L))
    mean_value = jnp.mean(corr, axis=(1, 2))                          # (B, L)
    weights, delay = jax.lax.top_k(mean_value, top_k)                 # (B, k)
    tmp_corr = jax.nn.softmax(weights, axis=-1)
    tmp_values = jnp.concatenate([values, values], axis=-1)           # (B,H,E,2L)
    init_index = jnp.arange(L, dtype=jnp.int32)
    delays_agg = jnp.zeros_like(values)
    for i in range(top_k):
        idx = init_index[None, :] + delay[:, i:i + 1]                 # (B, L)
        idx_full = jnp.broadcast_to(idx[:, None, None, :], (B, H, E, L))
        pattern = jnp.take_along_axis(tmp_values, idx_full, axis=-1)
        delays_agg = delays_agg + pattern * tmp_corr[:, i][:, None, None, None]
    return delays_agg


def auto_correlation(q, k, v, factor):
    """AutoCorrelation forward, eval mode (L == S, output_attention=False)."""
    B, L, H, E = q.shape
    qp = jnp.transpose(q, (0, 2, 3, 1))
    kp = jnp.transpose(k, (0, 2, 3, 1))
    vp = jnp.transpose(v, (0, 2, 3, 1))
    # TODO(synk): FFT-based period correlation + top-k delay gather have no clean Pallas
    # equivalent at this size; kept in plain JAX between the two kernels.
    qf = jnp.fft.rfft(qp, axis=-1)
    kf = jnp.fft.rfft(kp, axis=-1)
    corr = jnp.fft.irfft(qf * jnp.conj(kf), n=L, axis=-1)
    V = time_delay_agg_inference(vp, corr, factor)
    return jnp.transpose(V, (0, 3, 1, 2))                             # (B, L, H, E)


# ----------------------------- constants & parameters ------------------------------------

def build_decomp_matrix_np(L, kernel_size):
    """A with (A @ x)[l] = edge-replicated moving average of x over the L axis (odd kernel)."""
    pad = (kernel_size - 1) // 2
    A = np.zeros((L, L), np.float32)
    for l in range(L):
        for j in range(kernel_size):
            i = min(max(l + j - pad, 0), L - 1)
            A[l, i] += 1.0 / kernel_size
    return A


def init_params(key, cfg):
    keys = iter(jax.random.split(key, 64))

    def rnd(shape, scale=0.05):
        return (scale * jax.random.normal(next(keys), shape)).astype(F32)

    L, D, C, Ff = cfg['seq_len'], cfg['d_model'], cfg['c_out'], cfg['d_ff']
    latent = cfg['latent_dim']
    Cr = max(C // cfg['se_reduction'], 1)

    def conv3_cat(cout, cin):
        """PyTorch Conv1d weight (O, I, 3) -> concatenated channel-last taps (I, 3*O);
        tap k (k=0,1,2) is applied to x[(l + k - 1) % L]."""
        wc = rnd((cout, cin, 3))
        taps = [jnp.transpose(wc[:, :, k]) for k in range(3)]
        return jnp.concatenate(taps, axis=1)

    params = {
        # nn.Linear(latent, L*D): weight kept in applied (in, out) layout, reshaped to (latent, L, D)
        'l1_w': rnd((latent, L * D)).reshape(latent, L, D),
        'l1_b': rnd((L * D,)).reshape(L, D),
        'emb_w': conv3_cat(D, D),                                      # (D, 3D)
        'layers': [],
        'ln_gamma': jnp.ones((1, D), F32), 'ln_beta': jnp.zeros((1, D), F32),
        'proj_w': rnd((D, C)), 'proj_b': rnd((1, C)),
        'fusion': {},
    }
    for _ in range(cfg['d_layers']):
        params['layers'].append({
            'wqkv': rnd((D, 3 * D)),                                   # [Wq | Wk | Wv]
            'bqkv': rnd((1, 3 * D)),
            'wo': rnd((D, D)), 'bo': rnd((1, D)),
            'w_ff1': rnd((D, Ff)), 'w_ff2': rnd((Ff, D)),
            'w_trend': conv3_cat(C, D),                                # (D, 3C) circular proj conv
        })
    for br in ('a', 'b'):
        params['fusion'][br + '_w1'] = rnd((C, Cr))
        params['fusion'][br + '_b1'] = rnd((1, Cr))
        params['fusion'][br + '_w2'] = rnd((Cr, C))
        params['fusion'][br + '_b2'] = rnd((1, C))
    return params


# ----------------------------- forward ----------------------------------------------------

def generator_forward(params, cfg, A_np, x, trend1, trend2):
    B = x.shape[0]
    L, D, C, H = cfg['seq_len'], cfg['d_model'], cfg['c_out'], cfg['n_heads']
    E = D // H
    BL = B * L
    act = cfg.get('activation', 'relu')

    # Block-diagonal moving-average operator for all batches (trace-time constant).
    A_big = jnp.asarray(np.kron(np.eye(B, dtype=np.float32), A_np))

    # Kernel 1: x -> l1 -> TokenEmbedding circular conv -> fused QKV of layer 0.
    stem = _make_stem_call(B, L, D, cfg['latent_dim'])
    h, qkv = stem(x, params['l1_w'], params['l1_b'], params['emb_w'],
                  params['layers'][0]['wqkv'], params['layers'][0]['bqkv'])

    t1 = trend1.reshape(BL, C)
    t2 = trend2.reshape(BL, C)

    n_layers = len(params['layers'])
    out = None
    for i, lp in enumerate(params['layers']):
        qkv5 = qkv.reshape(B, L, 3, H, E)
        V = auto_correlation(qkv5[:, :, 0], qkv5[:, :, 1], qkv5[:, :, 2], cfg['factor'])
        V = V.reshape(BL, D)

        if i + 1 < n_layers:
            mid = _make_mid_layer_call(B, L, D, C, act)
            h, t1, t2, qkv = mid(V, h, t1, t2, A_big, lp, params['layers'][i + 1])
        else:
            last = _make_last_layer_call(B, L, C, act)
            out = last(V, h, t1, t2, A_big, lp, params)

    # out.view(-1, c_out, 1, seq_len): raw reinterpretation of the contiguous (B, L, C) result.
    return out.reshape(B, L, C).reshape(-1, C, 1, L)


# ----------------------------- main -------------------------------------------------------

if __name__ == "__main__":
    cfg = dict(latent_dim=16, seq_len=16, d_model=32, c_out=8, n_heads=4, d_ff=32,
               d_layers=1, moving_avg=5, factor=1, se_reduction=4, activation='relu')

    key = jax.random.PRNGKey(0)
    kp, kx, kt1, kt2 = jax.random.split(key, 4)
    params = init_params(kp, cfg)
    A_np = build_decomp_matrix_np(cfg['seq_len'], cfg['moving_avg'])

    B = 2
    x = jax.random.normal(kx, (B, cfg['latent_dim']), F32)
    trend1 = jax.random.normal(kt1, (B, cfg['seq_len'], cfg['c_out']), F32)
    trend2 = jax.random.normal(kt2, (B, cfg['seq_len'], cfg['c_out']), F32)

    fwd = jax.jit(lambda p, a, b, c: generator_forward(p, cfg, A_np, a, b, c))
    out = jax.block_until_ready(fwd(params, x, trend1, trend2))

    assert out.shape == (B, cfg['c_out'], 1, cfg['seq_len']), out.shape
    assert bool(jnp.all(jnp.isfinite(out)))
    print("KERNEL_OK")
</pallas_src>

<mosaic_0001>
module attributes {stable_mosaic.version = 11 : i64} {
  func.func @kernel(%arg0: i32, %arg1: memref<2x16xf32, #tpu.memory_space<smem>>, %arg2: memref<16x16x32xf32, #tpu.memory_space<vmem>>, %arg3: memref<16x32xf32, #tpu.memory_space<vmem>>, %arg4: memref<32x96xf32, #tpu.memory_space<vmem>>, %arg5: memref<32x96xf32, #tpu.memory_space<vmem>>, %arg6: memref<1x96xf32, #tpu.memory_space<vmem>>, %arg7: memref<32x32xf32, #tpu.memory_space<vmem>>, %arg8: memref<32x96xf32, #tpu.memory_space<vmem>>) attributes {dimension_semantics = [#tpu.dimension_semantics<arbitrary>], iteration_bounds = array<i64: 1>, scalar_prefetch = 0 : i64, scratch_operands = 0 : i64, tpu.core_type = #tpu.core_type<tc>, window_params = [{transform_indices = @transform_0, window_bounds = array<i64: 2, 16>}, {pipeline_mode = #tpu.pipeline_mode<synchronous>, transform_indices = @transform_1, window_bounds = array<i64: 16, 16, 32>}, {pipeline_mode = #tpu.pipeline_mode<synchronous>, transform_indices = @transform_2, window_bounds = array<i64: 16, 32>}, {pipeline_mode = #tpu.pipeline_mode<synchronous>, transform_indices = @transform_3, window_bounds = array<i64: 32, 96>}, {pipeline_mode = #tpu.pipeline_mode<synchronous>, transform_indices = @transform_4, window_bounds = array<i64: 32, 96>}, {pipeline_mode = #tpu.pipeline_mode<synchronous>, transform_indices = @transform_5, window_bounds = array<i64: 1, 96>}, {pipeline_mode = #tpu.pipeline_mode<synchronous>, transform_indices = @transform_6, window_bounds = array<i64: 32, 32>}, {pipeline_mode = #tpu.pipeline_mode<synchronous>, transform_indices = @transform_7, window_bounds = array<i64: 32, 96>}]} {
    %c0 = arith.constant 0 : index
    %c0_0 = arith.constant 0 : index
    %0 = vector.load %arg4[%c0, %c0_0] : memref<32x96xf32, #tpu.memory_space<vmem>>, vector<32x96xf32>
    %c0_1 = arith.constant 0 : index
    %c0_2 = arith.constant 0 : index
    %1 = vector.load %arg5[%c0_1, %c0_2] : memref<32x96xf32, #tpu.memory_space<vmem>>, vector<32x96xf32>
    %c0_3 = arith.constant 0 : index
    %c0_4 = arith.constant 0 : index
    %2 = vector.load %arg6[%c0_3, %c0_4] : memref<1x96xf32, #tpu.memory_space<vmem>>, vector<1x96xf32>
    %c0_5 = arith.constant 0 : index
    %c0_6 = arith.constant 0 : index
    %3 = vector.load %arg3[%c0_5, %c0_6] : memref<16x32xf32, #tpu.memory_space<vmem>>, vector<16x32xf32>
    %c0_7 = arith.constant 0 : index
    %c0_8 = arith.constant 0 : index
    %4 = memref.load %arg1[%c0_7, %c0_8] : memref<2x16xf32, #tpu.memory_space<smem>>
    %c0_9 = arith.constant 0 : index
    %c0_10 = arith.constant 0 : index
    %c0_11 = arith.constant 0 : index
    %5 = vector.load %arg2[%c0_9, %c0_10, %c0_11] : memref<16x16x32xf32, #tpu.memory_space<vmem>>, vector<1x16x32xf32>
    %6 = vector.shape_cast %5 : vector<1x16x32xf32> to vector<16x32xf32>
    %7 = vector.broadcast %4 : f32 to vector<16x32xf32>
    %8 = arith.mulf %7, %6 : vector<16x32xf32>
    %9 = arith.addf %3, %8 : vector<16x32xf32>
    %c0_12 = arith.constant 0 : index
    %c1 = arith.constant 1 : index
    %10 = memref.load %arg1[%c0_12, %c1] : memref<2x16xf32, #tpu.memory_space<smem>>
    %c1_13 = arith.constant 1 : index
    %c0_14 = arith.constant 0 : index
    %c0_15 = arith.constant 0 : index
    %11 = vector.load %arg2[%c1_13, %c0_14, %c0_15] : memref<16x16x32xf32, #tpu.memory_space<vmem>>, vector<1x16x32xf32>
    %12 = vector.shape_cast %11 : vector<1x16x32xf32> to vector<16x32xf32>
    %13 = vector.broadcast %10 : f32 to vector<16x32xf32>
    %14 = arith.mulf %13, %12 : vector<16x32xf32>
    %15 = arith.addf %9, %14 : vector<16x32xf32>
    %c0_16 = arith.constant 0 : index
    %c2 = arith.constant 2 : index
    %16 = memref.load %arg1[%c0_16, %c2] : memref<2x16xf32, #tpu.memory_space<smem>>
    %c2_17 = arith.constant 2 : index
    %c0_18 = arith.constant 0 : index
    %c0_19 = arith.constant 0 : index
    %17 = vector.load %arg2[%c2_17, %c0_18, %c0_19] : memref<16x16x32xf32, #tpu.memory_space<vmem>>, vector<1x16x32xf32>
    %18 = vector.shape_cast %17 : vector<1x16x32xf32> to vector<16x32xf32>
    %19 = vector.broadcast %16 : f32 to vector<16x32xf32>
    %20 = arith.mulf %19, %18 : vector<16x32xf32>
    %21 = arith.addf %15, %20 : vector<16x32xf32>
    %c0_20 = arith.constant 0 : index
    %c3 = arith.constant 3 : index
    %22 = memref.load %arg1[%c0_20, %c3] : memref<2x16xf32, #tpu.memory_space<smem>>
    %c3_21 = arith.constant 3 : index
    %c0_22 = arith.constant 0 : index
    %c0_23 = arith.constant 0 : index
    %23 = vector.load %arg2[%c3_21, %c0_22, %c0_23] : memref<16x16x32xf32, #tpu.memory_space<vmem>>, vector<1x16x32xf32>
    %24 = vector.shape_cast %23 : vector<1x16x32xf32> to vector<16x32xf32>
    %25 = vector.broadcast %22 : f32 to vector<16x32xf32>
    %26 = arith.mulf %25, %24 : vector<16x32xf32>
    %27 = arith.addf %21, %26 : vector<16x32xf32>
    %c0_24 = arith.constant 0 : index
    %c4 = arith.constant 4 : index
    %28 = memref.load %arg1[%c0_24, %c4] : memref<2x16xf32, #tpu.memory_space<smem>>
    %c4_25 = arith.constant 4 : index
    %c0_26 = arith.constant 0 : index
    %c0_27 = arith.constant 0 : index
    %29 = vector.load %arg2[%c4_25, %c0_26, %c0_27] : memref<16x16x32xf32, #tpu.memory_space<vmem>>, vector<1x16x32xf32>
    %30 = vector.shape_cast %29 : vector<1x16x32xf32> to vector<16x32xf32>
    %31 = vector.broadcast %28 : f32 to vector<16x32xf32>
    %32 = arith.mulf %31, %30 : vector<16x32xf32>
    %33 = arith.addf %27, %32 : vector<16x32xf32>
    %c0_28 = arith.constant 0 : index
    %c5 = arith.constant 5 : index
    %34 = memref.load %arg1[%c0_28, %c5] : memref<2x16xf32, #tpu.memory_space<smem>>
    %c5_29 = arith.constant 5 : index
    %c0_30 = arith.constant 0 : index
    %c0_31 = arith.constant 0 : index
    %35 = vector.load %arg2[%c5_29, %c0_30, %c0_31] : memref<16x16x32xf32, #tpu.memory_space<vmem>>, vector<1x16x32xf32>
    %36 = vector.shape_cast %35 : vector<1x16x32xf32> to vector<16x32xf32>
    %37 = vector.broadcast %34 : f32 to vector<16x32xf32>
    %38 = arith.mulf %37, %36 : vector<16x32xf32>
    %39 = arith.addf %33, %38 : vector<16x32xf32>
    %c0_32 = arith.constant 0 : index
    %c6 = arith.constant 6 : index
    %40 = memref.load %arg1[%c0_32, %c6] : memref<2x16xf32, #tpu.memory_space<smem>>
    %c6_33 = arith.constant 6 : index
    %c0_34 = arith.constant 0 : index
    %c0_35 = arith.constant 0 : index
    %41 = vector.load %arg2[%c6_33, %c0_34, %c0_35] : memref<16x16x32xf32, #tpu.memory_space<vmem>>, vector<1x16x32xf32>
    %42 = vector.shape_cast %41 : vector<1x16x32xf32> to vector<16x32xf32>
    %43 = vector.broadcast %40 : f32 to vector<16x32xf32>
    %44 = arith.mulf %43, %42 : vector<16x32xf32>
    %45 = arith.addf %39, %44 : vector<16x32xf32>
    %c0_36 = arith.constant 0 : index
    %c7 = arith.constant 7 : index
    %46 = memref.load %arg1[%c0_36, %c7] : memref<2x16xf32, #tpu.memory_space<smem>>
    %c7_37 = arith.constant 7 : index
    %c0_38 = arith.constant 0 : index
    %c0_39 = arith.constant 0 : index
    %47 = vector.load %arg2[%c7_37, %c0_38, %c0_39] : memref<16x16x32xf32, #tpu.memory_space<vmem>>, vector<1x16x32xf32>
    %48 = vector.shape_cast %47 : vector<1x16x32xf32> to vector<16x32xf32>
    %49 = vector.broadcast %46 : f32 to vector<16x32xf32>
    %50 = arith.mulf %49, %48 : vector<16x32xf32>
    %51 = arith.addf %45, %50 : vector<16x32xf32>
    %c0_40 = arith.constant 0 : index
    %c8 = arith.constant 8 : index
    %52 = memref.load %arg1[%c0_40, %c8] : memref<2x16xf32, #tpu.memory_space<smem>>
    %c8_41 = arith.constant 8 : index
    %c0_42 = arith.constant 0 : index
    %c0_43 = arith.constant 0 : index
    %53 = vector.load %arg2[%c8_41, %c0_42, %c0_43] : memref<16x16x32xf32, #tpu.memory_space<vmem>>, vector<1x16x32xf32>
    %54 = vector.shape_cast %53 : vector<1x16x32xf32> to vector<16x32xf32>
    %55 = vector.broadcast %52 : f32 to vector<16x32xf32>
    %56 = arith.mulf %55, %54 : vector<16x32xf32>
    %57 = arith.addf %51, %56 : vector<16x32xf32>
    %c0_44 = arith.constant 0 : index
    %c9 = arith.constant 9 : index
    %58 = memref.load %arg1[%c0_44, %c9] : memref<2x16xf32, #tpu.memory_space<smem>>
    %c9_45 = arith.constant 9 : index
    %c0_46 = arith.constant 0 : index
    %c0_47 = arith.constant 0 : index
    %59 = vector.load %arg2[%c9_45, %c0_46, %c0_47] : memref<16x16x32xf32, #tpu.memory_space<vmem>>, vector<1x16x32xf32>
    %60 = vector.shape_cast %59 : vector<1x16x32xf32> to vector<16x32xf32>
    %61 = vector.broadcast %58 : f32 to vector<16x32xf32>
    %62 = arith.mulf %61, %60 : vector<16x32xf32>
    %63 = arith.addf %57, %62 : vector<16x32xf32>
    %c0_48 = arith.constant 0 : index
    %c10 = arith.constant 10 : index
    %64 = memref.load %arg1[%c0_48, %c10] : memref<2x16xf32, #tpu.memory_space<smem>>
    %c10_49 = arith.constant 10 : index
    %c0_50 = arith.constant 0 : index
    %c0_51 = arith.constant 0 : index
    %65 = vector.load %arg2[%c10_49, %c0_50, %c0_51] : memref<16x16x32xf32, #tpu.memory_space<vmem>>, vector<1x16x32xf32>
    %66 = vector.shape_cast %65 : vector<1x16x32xf32> to vector<16x32xf32>
    %67 = vector.broadcast %64 : f32 to vector<16x32xf32>
    %68 = arith.mulf %67, %66 : vector<16x32xf32>
    %69 = arith.addf %63, %68 : vector<16x32xf32>
    %c0_52 = arith.constant 0 : index
    %c11 = arith.constant 11 : index
    %70 = memref.load %arg1[%c0_52, %c11] : memref<2x16xf32, #tpu.memory_space<smem>>
    %c11_53 = arith.constant 11 : index
    %c0_54 = arith.constant 0 : index
    %c0_55 = arith.constant 0 : index
    %71 = vector.load %arg2[%c11_53, %c0_54, %c0_55] : memref<16x16x32xf32, #tpu.memory_space<vmem>>, vector<1x16x32xf32>
    %72 = vector.shape_cast %71 : vector<1x16x32xf32> to vector<16x32xf32>
    %73 = vector.broadcast %70 : f32 to vector<16x32xf32>
    %74 = arith.mulf %73, %72 : vector<16x32xf32>
    %75 = arith.addf %69, %74 : vector<16x32xf32>
    %c0_56 = arith.constant 0 : index
    %c12 = arith.constant 12 : index
    %76 = memref.load %arg1[%c0_56, %c12] : memref<2x16xf32, #tpu.memory_space<smem>>
    %c12_57 = arith.constant 12 : index
    %c0_58 = arith.constant 0 : index
    %c0_59 = arith.constant 0 : index
    %77 = vector.load %arg2[%c12_57, %c0_58, %c0_59] : memref<16x16x32xf32, #tpu.memory_space<vmem>>, vector<1x16x32xf32>
    %78 = vector.shape_cast %77 : vector<1x16x32xf32> to vector<16x32xf32>
    %79 = vector.broadcast %76 : f32 to vector<16x32xf32>
    %80 = arith.mulf %79, %78 : vector<16x32xf32>
    %81 = arith.addf %75, %80 : vector<16x32xf32>
    %c0_60 = arith.constant 0 : index
    %c13 = arith.constant 13 : index
    %82 = memref.load %arg1[%c0_60, %c13] : memref<2x16xf32, #tpu.memory_space<smem>>
    %c13_61 = arith.constant 13 : index
    %c0_62 = arith.constant 0 : index
    %c0_63 = arith.constant 0 : index
    %83 = vector.load %arg2[%c13_61, %c0_62, %c0_63] : memref<16x16x32xf32, #tpu.memory_space<vmem>>, vector<1x16x32xf32>
    %84 = vector.shape_cast %83 : vector<1x16x32xf32> to vector<16x32xf32>
    %85 = vector.broadcast %82 : f32 to vector<16x32xf32>
    %86 = arith.mulf %85, %84 : vector<16x32xf32>
    %87 = arith.addf %81, %86 : vector<16x32xf32>
    %c0_64 = arith.constant 0 : index
    %c14 = arith.constant 14 : index
    %88 = memref.load %arg1[%c0_64, %c14] : memref<2x16xf32, #tpu.memory_space<smem>>
    %c14_65 = arith.constant 14 : index
    %c0_66 = arith.constant 0 : index
    %c0_67 = arith.constant 0 : index
    %89 = vector.load %arg2[%c14_65, %c0_66, %c0_67] : memref<16x16x32xf32, #tpu.memory_space<vmem>>, vector<1x16x32xf32>
    %90 = vector.shape_cast %89 : vector<1x16x32xf32> to vector<16x32xf32>
    %91 = vector.broadcast %88 : f32 to vector<16x32xf32>
    %92 = arith.mulf %91, %90 : vector<16x32xf32>
    %93 = arith.addf %87, %92 : vector<16x32xf32>
    %c0_68 = arith.constant 0 : index
    %c15 = arith.constant 15 : index
    %94 = memref.load %arg1[%c0_68, %c15] : memref<2x16xf32, #tpu.memory_space<smem>>
    %c15_69 = arith.constant 15 : index
    %c0_70 = arith.constant 0 : index
    %c0_71 = arith.constant 0 : index
    %95 = vector.load %arg2[%c15_69, %c0_70, %c0_71] : memref<16x16x32xf32, #tpu.memory_space<vmem>>, vector<1x16x32xf32>
    %96 = vector.shape_cast %95 : vector<1x16x32xf32> to vector<16x32xf32>
    %97 = vector.broadcast %94 : f32 to vector<16x32xf32>
    %98 = arith.mulf %97, %96 : vector<16x32xf32>
    %99 = arith.addf %93, %98 : vector<16x32xf32>
    %cst = arith.constant dense<0.000000e+00> : vector<16x96xf32>
    %100 = tpu.matmul %99, %0, %cst {dimension_numbers = #tpu.dot_dimension_numbers<[1], [0], [0], [1], [0, 0, 1, 1], [], []>} : vector<16x32xf32>, vector<32x96xf32>, vector<16x96xf32> -> vector<16x96xf32>
    %101 = vector.extract_strided_slice %100 {offsets = [0, 0], sizes = [16, 32], strides = [1, 1]} : vector<16x96xf32> to vector<16x32xf32>
    %102 = vector.extract_strided_slice %101 {offsets = [15, 0], sizes = [1, 32], strides = [1, 1]} : vector<16x32xf32> to vector<1x32xf32>
    %103 = vector.extract_strided_slice %101 {offsets = [0, 0], sizes = [15, 32], strides = [1, 1]} : vector<16x32xf32> to vector<15x32xf32>
    %104 = tpu.concatenate %102, %103 in 0 : vector<1x32xf32>, vector<15x32xf32> -> vector<16x32xf32>
    %105 = vector.extract_strided_slice %100 {offsets = [0, 32], sizes = [16, 32], strides = [1, 1]} : vector<16x96xf32> to vector<16x32xf32>
    %106 = arith.addf %104, %105 : vector<16x32xf32>
    %107 = vector.extract_strided_slice %100 {offsets = [0, 64], sizes = [16, 32], strides = [1, 1]} : vector<16x96xf32> to vector<16x32xf32>
    %108 = vector.extract_strided_slice %107 {offsets = [1, 0], sizes = [15, 32], strides = [1, 1]} : vector<16x32xf32> to vector<15x32xf32>
    %109 = vector.extract_strided_slice %107 {offsets = [0, 0], sizes = [1, 32], strides = [1, 1]} : vector<16x32xf32> to vector<1x32xf32>
    %110 = tpu.concatenate %108, %109 in 0 : vector<15x32xf32>, vector<1x32xf32> -> vector<16x32xf32>
    %111 = arith.addf %106, %110 : vector<16x32xf32>
    %c0_72 = arith.constant 0 : index
    %c0_73 = arith.constant 0 : index
    %112 = vector.load %arg7[%c0_72, %c0_73] : memref<32x32xf32, #tpu.memory_space<vmem>>, vector<16x32xf32>
    tpu.vector_store %arg7[%c0_72, %c0_73], %111 {strides = array<i32>} : memref<32x32xf32, #tpu.memory_space<vmem>>, vector<16x32xf32>,
    %cst_74 = arith.constant dense<0.000000e+00> : vector<16x96xf32>
    %113 = tpu.matmul %111, %1, %cst_74 {dimension_numbers = #tpu.dot_dimension_numbers<[1], [0], [0], [1], [0, 0, 1, 1], [], []>} : vector<16x32xf32>, vector<32x96xf32>, vector<16x96xf32> -> vector<16x96xf32>
    %114 = vector.broadcast %2 : vector<1x96xf32> to vector<16x96xf32>
    %115 = arith.addf %113, %114 : vector<16x96xf32>
    %c0_75 = arith.constant 0 : index
    %c0_76 = arith.constant 0 : index
    %116 = vector.load %arg8[%c0_75, %c0_76] : memref<32x96xf32, #tpu.memory_space<vmem>>, vector<16x96xf32>
    tpu.vector_store %arg8[%c0_75, %c0_76], %115 {strides = array<i32>} : memref<32x96xf32, #tpu.memory_space<vmem>>, vector<16x96xf32>,
    %c0_77 = arith.constant 0 : index
    %c0_78 = arith.constant 0 : index
    %117 = vector.load %arg3[%c0_77, %c0_78] : memref<16x32xf32, #tpu.memory_space<vmem>>, vector<16x32xf32>
    %c1_79 = arith.constant 1 : index
    %c0_80 = arith.constant 0 : index
    %118 = memref.load %arg1[%c1_79, %c0_80] : memref<2x16xf32, #tpu.memory_space<smem>>
    %c0_81 = arith.constant 0 : index
    %c0_82 = arith.constant 0 : index
    %c0_83 = arith.constant 0 : index
    %119 = vector.load %arg2[%c0_81, %c0_82, %c0_83] : memref<16x16x32xf32, #tpu.memory_space<vmem>>, vector<1x16x32xf32>
    %120 = vector.shape_cast %119 : vector<1x16x32xf32> to vector<16x32xf32>
    %121 = vector.broadcast %118 : f32 to vector<16x32xf32>
    %122 = arith.mulf %121, %120 : vector<16x32xf32>
    %123 = arith.addf %117, %122 : vector<16x32xf32>
    %c1_84 = arith.constant 1 : index
    %c1_85 = arith.constant 1 : index
    %124 = memref.load %arg1[%c1_84, %c1_85] : memref<2x16xf32, #tpu.memory_space<smem>>
    %c1_86 = arith.constant 1 : index
    %c0_87 = arith.constant 0 : index
    %c0_88 = arith.constant 0 : index
    %125 = vector.load %arg2[%c1_86, %c0_87, %c0_88] : memref<16x16x32xf32, #tpu.memory_space<vmem>>, vector<1x16x32xf32>
    %126 = vector.shape_cast %125 : vector<1x16x32xf32> to vector<16x32xf32>
    %127 = vector.broadcast %124 : f32 to vector<16x32xf32>
    %128 = arith.mulf %127, %126 : vector<16x32xf32>
    %129 = arith.addf %123, %128 : vector<16x32xf32>
    %c1_89 = arith.constant 1 : index
    %c2_90 = arith.constant 2 : index
    %130 = memref.load %arg1[%c1_89, %c2_90] : memref<2x16xf32, #tpu.memory_space<smem>>
    %c2_91 = arith.constant 2 : index
    %c0_92 = arith.constant 0 : index
    %c0_93 = arith.constant 0 : index
    %131 = vector.load %arg2[%c2_91, %c0_92, %c0_93] : memref<16x16x32xf32, #tpu.memory_space<vmem>>, vector<1x16x32xf32>
    %132 = vector.shape_cast %131 : vector<1x16x32xf32> to vector<16x32xf32>
    %133 = vector.broadcast %130 : f32 to vector<16x32xf32>
    %134 = arith.mulf %133, %132 : vector<16x32xf32>
    %135 = arith.addf %129, %134 : vector<16x32xf32>
    %c1_94 = arith.constant 1 : index
    %c3_95 = arith.constant 3 : index
    %136 = memref.load %arg1[%c1_94, %c3_95] : memref<2x16xf32, #tpu.memory_space<smem>>
    %c3_96 = arith.constant 3 : index
    %c0_97 = arith.constant 0 : index
    %c0_98 = arith.constant 0 : index
    %137 = vector.load %arg2[%c3_96, %c0_97, %c0_98] : memref<16x16x32xf32, #tpu.memory_space<vmem>>, vector<1x16x32xf32>
    %138 = vector.shape_cast %137 : vector<1x16x32xf32> to vector<16x32xf32>
    %139 = vector.broadcast %136 : f32 to vector<16x32xf32>
    %140 = arith.mulf %139, %138 : vector<16x32xf32>
    %141 = arith.addf %135, %140 : vector<16x32xf32>
    %c1_99 = arith.constant 1 : index
    %c4_100 = arith.constant 4 : index
    %142 = memref.load %arg1[%c1_99, %c4_100] : memref<2x16xf32, #tpu.memory_space<smem>>
    %c4_101 = arith.constant 4 : index
    %c0_102 = arith.constant 0 : index
    %c0_103 = arith.constant 0 : index
    %143 = vector.load %arg2[%c4_101, %c0_102, %c0_103] : memref<16x16x32xf32, #tpu.memory_space<vmem>>, vector<1x16x32xf32>
    %144 = vector.shape_cast %143 : vector<1x16x32xf32> to vector<16x32xf32>
    %145 = vector.broadcast %142 : f32 to vector<16x32xf32>
    %146 = arith.mulf %145, %144 : vector<16x32xf32>
    %147 = arith.addf %141, %146 : vector<16x32xf32>
    %c1_104 = arith.constant 1 : index
    %c5_105 = arith.constant 5 : index
    %148 = memref.load %arg1[%c1_104, %c5_105] : memref<2x16xf32, #tpu.memory_space<smem>>
    %c5_106 = arith.constant 5 : index
    %c0_107 = arith.constant 0 : index
    %c0_108 = arith.constant 0 : index
    %149 = vector.load %arg2[%c5_106, %c0_107, %c0_108] : memref<16x16x32xf32, #tpu.memory_space<vmem>>, vector<1x16x32xf32>
    %150 = vector.shape_cast %149 : vector<1x16x32xf32> to vector<16x32xf32>
    %151 = vector.broadcast %148 : f32 to vector<16x32xf32>
    %152 = arith.mulf %151, %150 : vector<16x32xf32>
    %153 = arith.addf %147, %152 : vector<16x32xf32>
    %c1_109 = arith.constant 1 : index
    %c6_110 = arith.constant 6 : index
    %154 = memref.load %arg1[%c1_109, %c6_110] : memref<2x16xf32, #tpu.memory_space<smem>>
    %c6_111 = arith.constant 6 : index
    %c0_112 = arith.constant 0 : index
    %c0_113 = arith.constant 0 : index
    %155 = vector.load %arg2[%c6_111, %c0_112, %c0_113] : memref<16x16x32xf32, #tpu.memory_space<vmem>>, vector<1x16x32xf32>
    %156 = vector.shape_cast %155 : vector<1x16x32xf32> to vector<16x32xf32>
    %157 = vector.broadcast %154 : f32 to vector<16x32xf32>
    %158 = arith.mulf %157, %156 : vector<16x32xf32>
    %159 = arith.addf %153, %158 : vector<16x32xf32>
    %c1_114 = arith.constant 1 : index
    %c7_115 = arith.constant 7 : index
    %160 = memref.load %arg1[%c1_114, %c7_115] : memref<2x16xf32, #tpu.memory_space<smem>>
    %c7_116 = arith.constant 7 : index
    %c0_117 = arith.constant 0 : index
    %c0_118 = arith.constant 0 : index
    %161 = vector.load %arg2[%c7_116, %c0_117, %c0_118] : memref<16x16x32xf32, #tpu.memory_space<vmem>>, vector<1x16x32xf32>
    %162 = vector.shape_cast %161 : vector<1x16x32xf32> to vector<16x32xf32>
    %163 = vector.broadcast %160 : f32 to vector<16x32xf32>
    %164 = arith.mulf %163, %162 : vector<16x32xf32>
    %165 = arith.addf %159, %164 : vector<16x32xf32>
    %c1_119 = arith.constant 1 : index
    %c8_120 = arith.constant 8 : index
    %166 = memref.load %arg1[%c1_119, %c8_120] : memref<2x16xf32, #tpu.memory_space<smem>>
    %c8_121 = arith.constant 8 : index
    %c0_122 = arith.constant 0 : index
    %c0_123 = arith.constant 0 : index
    %167 = vector.load %arg2[%c8_121, %c0_122, %c0_123] : memref<16x16x32xf32, #tpu.memory_space<vmem>>, vector<1x16x32xf32>
    %168 = vector.shape_cast %167 : vector<1x16x32xf32> to vector<16x32xf32>
    %169 = vector.broadcast %166 : f32 to vector<16x32xf32>
    %170 = arith.mulf %169, %168 : vector<16x32xf32>
    %171 = arith.addf %165, %170 : vector<16x32xf32>
    %c1_124 = arith.constant 1 : index
    %c9_125 = arith.constant 9 : index
    %172 = memref.load %arg1[%c1_124, %c9_125] : memref<2x16xf32, #tpu.memory_space<smem>>
    %c9_126 = arith.constant 9 : index
    %c0_127 = arith.constant 0 : index
    %c0_128 = arith.constant 0 : index
    %173 = vector.load %arg2[%c9_126, %c0_127, %c0_128] : memref<16x16x32xf32, #tpu.memory_space<vmem>>, vector<1x16x32xf32>
    %174 = vector.shape_cast %173 : vector<1x16x32xf32> to vector<16x32xf32>
    %175 = vector.broadcast %172 : f32 to vector<16x32xf32>
    %176 = arith.mulf %175, %174 : vector<16x32xf32>
    %177 = arith.addf %171, %176 : vector<16x32xf32>
    %c1_129 = arith.constant 1 : index
    %c10_130 = arith.constant 10 : index
    %178 = memref.load %arg1[%c1_129, %c10_130] : memref<2x16xf32, #tpu.memory_space<smem>>
    %c10_131 = arith.constant 10 : index
    %c0_132 = arith.constant 0 : index
    %c0_133 = arith.constant 0 : index
    %179 = vector.load %arg2[%c10_131, %c0_132, %c0_133] : memref<16x16x32xf32, #tpu.memory_space<vmem>>, vector<1x16x32xf32>
    %180 = vector.shape_cast %179 : vector<1x16x32xf32> to vector<16x32xf32>
    %181 = vector.broadcast %178 : f32 to vector<16x32xf32>
    %182 = arith.mulf %181, %180 : vector<16x32xf32>
    %183 = arith.addf %177, %182 : vector<16x32xf32>
    %c1_134 = arith.constant 1 : index
    %c11_135 = arith.constant 11 : index
    %184 = memref.load %arg1[%c1_134, %c11_135] : memref<2x16xf32, #tpu.memory_space<smem>>
    %c11_136 = arith.constant 11 : index
    %c0_137 = arith.constant 0 : index
    %c0_138 = arith.constant 0 : index
    %185 = vector.load %arg2[%c11_136, %c0_137, %c0_138] : memref<16x16x32xf32, #tpu.memory_space<vmem>>, vector<1x16x32xf32>
    %186 = vector.shape_cast %185 : vector<1x16x32xf32> to vector<16x32xf32>
    %187 = vector.broadcast %184 : f32 to vector<16x32xf32>
    %188 = arith.mulf %187, %186 : vector<16x32xf32>
    %189 = arith.addf %183, %188 : vector<16x32xf32>
    %c1_139 = arith.constant 1 : index
    %c12_140 = arith.constant 12 : index
    %190 = memref.load %arg1[%c1_139, %c12_140] : memref<2x16xf32, #tpu.memory_space<smem>>
    %c12_141 = arith.constant 12 : index
    %c0_142 = arith.constant 0 : index
    %c0_143 = arith.constant 0 : index
    %191 = vector.load %arg2[%c12_141, %c0_142, %c0_143] : memref<16x16x32xf32, #tpu.memory_space<vmem>>, vector<1x16x32xf32>
    %192 = vector.shape_cast %191 : vector<1x16x32xf32> to vector<16x32xf32>
    %193 = vector.broadcast %190 : f32 to vector<16x32xf32>
    %194 = arith.mulf %193, %192 : vector<16x32xf32>
    %195 = arith.addf %189, %194 : vector<16x32xf32>
    %c1_144 = arith.constant 1 : index
    %c13_145 = arith.constant 13 : index
    %196 = memref.load %arg1[%c1_144, %c13_145] : memref<2x16xf32, #tpu.memory_space<smem>>
    %c13_146 = arith.constant 13 : index
    %c0_147 = arith.constant 0 : index
    %c0_148 = arith.constant 0 : index
    %197 = vector.load %arg2[%c13_146, %c0_147, %c0_148] : memref<16x16x32xf32, #tpu.memory_space<vmem>>, vector<1x16x32xf32>
    %198 = vector.shape_cast %197 : vector<1x16x32xf32> to vector<16x32xf32>
    %199 = vector.broadcast %196 : f32 to vector<16x32xf32>
    %200 = arith.mulf %199, %198 : vector<16x32xf32>
    %201 = arith.addf %195, %200 : vector<16x32xf32>
    %c1_149 = arith.constant 1 : index
    %c14_150 = arith.constant 14 : index
    %202 = memref.load %arg1[%c1_149, %c14_150] : memref<2x16xf32, #tpu.memory_space<smem>>
    %c14_151 = arith.constant 14 : index
    %c0_152 = arith.constant 0 : index
    %c0_153 = arith.constant 0 : index
    %203 = vector.load %arg2[%c14_151, %c0_152, %c0_153] : memref<16x16x32xf32, #tpu.memory_space<vmem>>, vector<1x16x32xf32>
    %204 = vector.shape_cast %203 : vector<1x16x32xf32> to vector<16x32xf32>
    %205 = vector.broadcast %202 : f32 to vector<16x32xf32>
    %206 = arith.mulf %205, %204 : vector<16x32xf32>
    %207 = arith.addf %201, %206 : vector<16x32xf32>
    %c1_154 = arith.constant 1 : index
    %c15_155 = arith.constant 15 : index
    %208 = memref.load %arg1[%c1_154, %c15_155] : memref<2x16xf32, #tpu.memory_space<smem>>
    %c15_156 = arith.constant 15 : index
    %c0_157 = arith.constant 0 : index
    %c0_158 = arith.constant 0 : index
    %209 = vector.load %arg2[%c15_156, %c0_157, %c0_158] : memref<16x16x32xf32, #tpu.memory_space<vmem>>, vector<1x16x32xf32>
    %210 = vector.shape_cast %209 : vector<1x16x32xf32> to vector<16x32xf32>
    %211 = vector.broadcast %208 : f32 to vector<16x32xf32>
    %212 = arith.mulf %211, %210 : vector<16x32xf32>
    %213 = arith.addf %207, %212 : vector<16x32xf32>
    %cst_159 = arith.constant dense<0.000000e+00> : vector<16x96xf32>
    %214 = tpu.matmul %213, %0, %cst_159 {dimension_numbers = #tpu.dot_dimension_numbers<[1], [0], [0], [1], [0, 0, 1, 1], [], []>} : vector<16x32xf32>, vector<32x96xf32>, vector<16x96xf32> -> vector<16x96xf32>
    %215 = vector.extract_strided_slice %214 {offsets = [0, 0], sizes = [16, 32], strides = [1, 1]} : vector<16x96xf32> to vector<16x32xf32>
    %216 = vector.extract_strided_slice %215 {offsets = [15, 0], sizes = [1, 32], strides = [1, 1]} : vector<16x32xf32> to vector<1x32xf32>
    %217 = vector.extract_strided_slice %215 {offsets = [0, 0], sizes = [15, 32], strides = [1, 1]} : vector<16x32xf32> to vector<15x32xf32>
    %218 = tpu.concatenate %216, %217 in 0 : vector<1x32xf32>, vector<15x32xf32> -> vector<16x32xf32>
    %219 = vector.extract_strided_slice %214 {offsets = [0, 32], sizes = [16, 32], strides = [1, 1]} : vector<16x96xf32> to vector<16x32xf32>
    %220 = arith.addf %218, %219 : vector<16x32xf32>
    %221 = vector.extract_strided_slice %214 {offsets = [0, 64], sizes = [16, 32], strides = [1, 1]} : vector<16x96xf32> to vector<16x32xf32>
    %222 = vector.extract_strided_slice %221 {offsets = [1, 0], sizes = [15, 32], strides = [1, 1]} : vector<16x32xf32> to vector<15x32xf32>
    %223 = vector.extract_strided_slice %221 {offsets = [0, 0], sizes = [1, 32], strides = [1, 1]} : vector<16x32xf32> to vector<1x32xf32>
    %224 = tpu.concatenate %222, %223 in 0 : vector<15x32xf32>, vector<1x32xf32> -> vector<16x32xf32>
    %225 = arith.addf %220, %224 : vector<16x32xf32>
    %c16 = arith.constant 16 : index
    %c0_160 = arith.constant 0 : index
    %226 = vector.load %arg7[%c16, %c0_160] : memref<32x32xf32, #tpu.memory_space<vmem>>, vector<16x32xf32>
    tpu.vector_store %arg7[%c16, %c0_160], %225 {strides = array<i32>} : memref<32x32xf32, #tpu.memory_space<vmem>>, vector<16x32xf32>,
    %cst_161 = arith.constant dense<0.000000e+00> : vector<16x96xf32>
    %227 = tpu.matmul %225, %1, %cst_161 {dimension_numbers = #tpu.dot_dimension_numbers<[1], [0], [0], [1], [0, 0, 1, 1], [], []>} : vector<16x32xf32>, vector<32x96xf32>, vector<16x96xf32> -> vector<16x96xf32>
    %228 = vector.broadcast %2 : vector<1x96xf32> to vector<16x96xf32>
    %229 = arith.addf %227, %228 : vector<16x96xf32>
    %c16_162 = arith.constant 16 : index
    %c0_163 = arith.constant 0 : index
    %230 = vector.load %arg8[%c16_162, %c0_163] : memref<32x96xf32, #tpu.memory_space<vmem>>, vector<16x96xf32>
    tpu.vector_store %arg8[%c16_162, %c0_163], %229 {strides = array<i32>} : memref<32x96xf32, #tpu.memory_space<vmem>>, vector<16x96xf32>,
    return
  }
  func.func @transform_0(%arg0: i32) -> (i32, i32) {
    %c0_i32 = arith.constant 0 : i32
    %c0_i32_0 = arith.constant 0 : i32
    %c0_i32_1 = arith.constant 0 : i32
    return %c0_i32, %c0_i32_0 : i32, i32
  }
  func.func @transform_1(%arg0: i32) -> (i32, i32, i32) {
    %c0_i32 = arith.constant 0 : i32
    %c0_i32_0 = arith.constant 0 : i32
    %c0_i32_1 = arith.constant 0 : i32
    %c0_i32_2 = arith.constant 0 : i32
    return %c0_i32, %c0_i32_0, %c0_i32_1 : i32, i32, i32
  }
  func.func @transform_2(%arg0: i32) -> (i32, i32) {
    %c0_i32 = arith.constant 0 : i32
    %c0_i32_0 = arith.constant 0 : i32
    %c0_i32_1 = arith.constant 0 : i32
    return %c0_i32, %c0_i32_0 : i32, i32
  }
  func.func @transform_3(%arg0: i32) -> (i32, i32) {
    %c0_i32 = arith.constant 0 : i32
    %c0_i32_0 = arith.constant 0 : i32
    %c0_i32_1 = arith.constant 0 : i32
    return %c0_i32, %c0_i32_0 : i32, i32
  }
  func.func @transform_4(%arg0: i32) -> (i32, i32) {
    %c0_i32 = arith.constant 0 : i32
    %c0_i32_0 = arith.constant 0 : i32
    %c0_i32_1 = arith.constant 0 : i32
    return %c0_i32, %c0_i32_0 : i32, i32
  }
  func.func @transform_5(%arg0: i32) -> (i32, i32) {
    %c0_i32 = arith.constant 0 : i32
    %c0_i32_0 = arith.constant 0 : i32
    %c0_i32_1 = arith.constant 0 : i32
    return %c0_i32, %c0_i32_0 : i32, i32
  }
  func.func @transform_6(%arg0: i32) -> (i32, i32) {
    %c0_i32 = arith.constant 0 : i32
    %c0_i32_0 = arith.constant 0 : i32
    %c0_i32_1 = arith.constant 0 : i32
    return %c0_i32, %c0_i32_0 : i32, i32
  }
  func.func @transform_7(%arg0: i32) -> (i32, i32) {
    %c0_i32 = arith.constant 0 : i32
    %c0_i32_0 = arith.constant 0 : i32
    %c0_i32_1 = arith.constant 0 : i32
    return %c0_i32, %c0_i32_0 : i32, i32
  }
}

module attributes {stable_mosaic.version = 11 : i64} {
  func.func @kernel(%arg0: i32, %arg1: memref<32x32xf32, #tpu.memory_space<vmem>>, %arg2: memref<32x32xf32, #tpu.memory_space<vmem>>, %arg3: memref<32x8xf32, #tpu.memory_space<vmem>>, %arg4: memref<32x8xf32, #tpu.memory_space<vmem>>, %arg5: memref<32x32xf32, #tpu.memory_space<vmem>>, %arg6: memref<32x32xf32, #tpu.memory_space<vmem>>, %arg7: memref<1x32xf32, #tpu.memory_space<vmem>>, %arg8: memref<32x32xf32, #tpu.memory_space<vmem>>, %arg9: memref<32x32xf32, #tpu.memory_space<vmem>>, %arg10: memref<32x24xf32, #tpu.memory_space<vmem>>, %arg11: memref<1x32xf32, #tpu.memory_space<vmem>>, %arg12: memref<1x32xf32, #tpu.memory_space<vmem>>, %arg13: memref<32x8xf32, #tpu.memory_space<vmem>>, %arg14: memref<1x8xf32, #tpu.memory_space<vmem>>, %arg15: memref<8x2xf32, #tpu.memory_space<vmem>>, %arg16: memref<1x2xf32, #tpu.memory_space<vmem>>, %arg17: memref<2x8xf32, #tpu.memory_space<vmem>>, %arg18: memref<1x8xf32, #tpu.memory_space<vmem>>, %arg19: memref<8x2xf32, #tpu.memory_space<vmem>>, %arg20: memref<1x2xf32, #tpu.memory_space<vmem>>, %arg21: memref<2x8xf32, #tpu.memory_space<vmem>>, %arg22: memref<1x8xf32, #tpu.memory_space<vmem>>, %arg23: memref<32x8xf32, #tpu.memory_space<vmem>>) attributes {dimension_semantics = [#tpu.dimension_semantics<arbitrary>], iteration_bounds = array<i64: 1>, scalar_prefetch = 0 : i64, scratch_operands = 0 : i64, tpu.core_type = #tpu.core_type<tc>, window_params = [{pipeline_mode = #tpu.pipeline_mode<synchronous>, transform_indices = @transform_0, window_bounds = array<i64: 32, 32>}, {pipeline_mode = #tpu.pipeline_mode<synchronous>, transform_indices = @transform_1, window_bounds = array<i64: 32, 32>}, {pipeline_mode = #tpu.pipeline_mode<synchronous>, transform_indices = @transform_2, window_bounds = array<i64: 32, 8>}, {pipeline_mode = #tpu.pipeline_mode<synchronous>, transform_indices = @transform_3, window_bounds = array<i64: 32, 8>}, {pipeline_mode = #tpu.pipeline_mode<synchronous>, transform_indices = @transform_4, window_bounds = array<i64: 32, 32>}, {pipeline_mode = #tpu.pipeline_mode<synchronous>, transform_indices = @transform_5, window_bounds = array<i64: 32, 32>}, {pipeline_mode = #tpu.pipeline_mode<synchronous>, transform_indices = @transform_6, window_bounds = array<i64: 1, 32>}, {pipeline_mode = #tpu.pipeline_mode<synchronous>, transform_indices = @transform_7, window_bounds = array<i64: 32, 32>}, {pipeline_mode = #tpu.pipeline_mode<synchronous>, transform_indices = @transform_8, window_bounds = array<i64: 32, 32>}, {pipeline_mode = #tpu.pipeline_mode<synchronous>, transform_indices = @transform_9, window_bounds = array<i64: 32, 24>}, {pipeline_mode = #tpu.pipeline_mode<synchronous>, transform_indices = @transform_10, window_bounds = array<i64: 1, 32>}, {pipeline_mode = #tpu.pipeline_mode<synchronous>, transform_indices = @transform_11, window_bounds = array<i64: 1, 32>}, {pipeline_mode = #tpu.pipeline_mode<synchronous>, transform_indices = @transform_12, window_bounds = array<i64: 32, 8>}, {pipeline_mode = #tpu.pipeline_mode<synchronous>, transform_indices = @transform_13, window_bounds = array<i64: 1, 8>}, {pipeline_mode = #tpu.pipeline_mode<synchronous>, transform_indices = @transform_14, window_bounds = array<i64: 8, 2>}, {pipeline_mode = #tpu.pipeline_mode<synchronous>, transform_indices = @transform_15, window_bounds = array<i64: 1, 2>}, {pipeline_mode = #tpu.pipeline_mode<synchronous>, transform_indices = @transform_16, window_bounds = array<i64: 2, 8>}, {pipeline_mode = #tpu.pipeline_mode<synchronous>, transform_indices = @transform_17, window_bounds = array<i64: 1, 8>}, {pipeline_mode = #tpu.pipeline_mode<synchronous>, transform_indices = @transform_18, window_bounds = array<i64: 8, 2>}, {pipeline_mode = #tpu.pipeline_mode<synchronous>, transform_indices = @transform_19, window_bounds = array<i64: 1, 2>}, {pipeline_mode = #tpu.pipeline_mode<synchronous>, transform_indices = @transform_20, window_bounds = array<i64: 2, 8>}, {pipeline_mode = #tpu.pipeline_mode<synchronous>, transform_indices = @transform_21, window_bounds = array<i64: 1, 8>}, {pipeline_mode = #tpu.pipeline_mode<synchronous>, transform_indices = @transform_22, window_bounds = array<i64: 32, 8>}]} {
    %c0 = arith.constant 0 : index
    %c0_0 = arith.constant 0 : index
    %0 = vector.load %arg1[%c0, %c0_0] : memref<32x32xf32, #tpu.memory_space<vmem>>, vector<32x32xf32>
    %c0_1 = arith.constant 0 : index
    %c0_2 = arith.constant 0 : index
    %1 = vector.load %arg2[%c0_1, %c0_2] : memref<32x32xf32, #tpu.memory_space<vmem>>, vector<32x32xf32>
    %c0_3 = arith.constant 0 : index
    %c0_4 = arith.constant 0 : index
    %2 = vector.load %arg3[%c0_3, %c0_4] : memref<32x8xf32, #tpu.memory_space<vmem>>, vector<32x8xf32>
    %c0_5 = arith.constant 0 : index
    %c0_6 = arith.constant 0 : index
    %3 = vector.load %arg4[%c0_5, %c0_6] : memref<32x8xf32, #tpu.memory_space<vmem>>, vector<32x8xf32>
    %c0_7 = arith.constant 0 : index
    %c0_8 = arith.constant 0 : index
    %4 = vector.load %arg5[%c0_7, %c0_8] : memref<32x32xf32, #tpu.memory_space<vmem>>, vector<32x32xf32>
    %c0_9 = arith.constant 0 : index
    %c0_10 = arith.constant 0 : index
    %5 = vector.load %arg6[%c0_9, %c0_10] : memref<32x32xf32, #tpu.memory_space<vmem>>, vector<32x32xf32>
    %c0_11 = arith.constant 0 : index
    %c0_12 = arith.constant 0 : index
    %6 = vector.load %arg7[%c0_11, %c0_12] : memref<1x32xf32, #tpu.memory_space<vmem>>, vector<1x32xf32>
    %c0_13 = arith.constant 0 : index
    %c0_14 = arith.constant 0 : index
    %7 = vector.load %arg8[%c0_13, %c0_14] : memref<32x32xf32, #tpu.memory_space<vmem>>, vector<32x32xf32>
    %c0_15 = arith.constant 0 : index
    %c0_16 = arith.constant 0 : index
    %8 = vector.load %arg9[%c0_15, %c0_16] : memref<32x32xf32, #tpu.memory_space<vmem>>, vector<32x32xf32>
    %c0_17 = arith.constant 0 : index
    %c0_18 = arith.constant 0 : index
    %9 = vector.load %arg10[%c0_17, %c0_18] : memref<32x24xf32, #tpu.memory_space<vmem>>, vector<32x24xf32>
    %cst = arith.constant dense<0.000000e+00> : vector<32x32xf32>
    %10 = tpu.matmul %0, %5, %cst {dimension_numbers = #tpu.dot_dimension_numbers<[1], [0], [0], [1], [0, 0, 1, 1], [], []>} : vector<32x32xf32>, vector<32x32xf32>, vector<32x32xf32> -> vector<32x32xf32>
    %11 = vector.broadcast %6 : vector<1x32xf32> to vector<32x32xf32>
    %12 = arith.addf %10, %11 : vector<32x32xf32>
    %13 = arith.addf %1, %12 : vector<32x32xf32>
    %cst_19 = arith.constant dense<0.000000e+00> : vector<32x32xf32>
    %14 = tpu.matmul %4, %13, %cst_19 {dimension_numbers = #tpu.dot_dimension_numbers<[1], [0], [0], [1], [0, 0, 1, 1], [], []>} : vector<32x32xf32>, vector<32x32xf32>, vector<32x32xf32> -> vector<32x32xf32>
    %15 = arith.subf %13, %14 : vector<32x32xf32>
    %cst_20 = arith.constant dense<0.000000e+00> : vector<32x32xf32>
    %16 = tpu.matmul %15, %7, %cst_20 {dimension_numbers = #tpu.dot_dimension_numbers<[1], [0], [0], [1], [0, 0, 1, 1], [], []>} : vector<32x32xf32>, vector<32x32xf32>, vector<32x32xf32> -> vector<32x32xf32>
    %cst_21 = arith.constant 0.000000e+00 : f32
    %17 = vector.broadcast %cst_21 : f32 to vector<32x32xf32>
    %18 = arith.maximumf %16, %17 : vector<32x32xf32>
    %cst_22 = arith.constant dense<0.000000e+00> : vector<32x32xf32>
    %19 = tpu.matmul %18, %8, %cst_22 {dimension_numbers = #tpu.dot_dimension_numbers<[1], [0], [0], [1], [0, 0, 1, 1], [], []>} : vector<32x32xf32>, vector<32x32xf32>, vector<32x32xf32> -> vector<32x32xf32>
    %20 = arith.addf %15, %19 : vector<32x32xf32>
    %cst_23 = arith.constant dense<0.000000e+00> : vector<32x32xf32>
    %21 = tpu.matmul %4, %20, %cst_23 {dimension_numbers = #tpu.dot_dimension_numbers<[1], [0], [0], [1], [0, 0, 1, 1], [], []>} : vector<32x32xf32>, vector<32x32xf32>, vector<32x32xf32> -> vector<32x32xf32>
    %22 = arith.subf %20, %21 : vector<32x32xf32>
    %23 = tpu.concatenate %14, %21 in 0 : vector<32x32xf32>, vector<32x32xf32> -> vector<64x32xf32>
    %cst_24 = arith.constant dense<0.000000e+00> : vector<64x24xf32>
    %24 = tpu.matmul %23, %9, %cst_24 {dimension_numbers = #tpu.dot_dimension_numbers<[1], [0], [0], [1], [0, 0, 1, 1], [], []>} : vector<64x32xf32>, vector<32x24xf32>, vector<64x24xf32> -> vector<64x24xf32>
    %25 = vector.extract_strided_slice %2 {offsets = [0, 0], sizes = [16, 8], strides = [1, 1]} : vector<32x8xf32> to vector<16x8xf32>
    %26 = vector.extract_strided_slice %24 {offsets = [0, 0], sizes = [16, 24], strides = [1, 1]} : vector<64x24xf32> to vector<16x24xf32>
    %27 = vector.extract_strided_slice %26 {offsets = [0, 0], sizes = [16, 8], strides = [1, 1]} : vector<16x24xf32> to vector<16x8xf32>
    %28 = vector.extract_strided_slice %27 {offsets = [15, 0], sizes = [1, 8], strides = [1, 1]} : vector<16x8xf32> to vector<1x8xf32>
    %29 = vector.extract_strided_slice %27 {offsets = [0, 0], sizes = [15, 8], strides = [1, 1]} : vector<16x8xf32> to vector<15x8xf32>
    %30 = tpu.concatenate %28, %29 in 0 : vector<1x8xf32>, vector<15x8xf32> -> vector<16x8xf32>
    %31 = vector.extract_strided_slice %26 {offsets = [0, 8], sizes = [16, 8], strides = [1, 1]} : vector<16x24xf32> to vector<16x8xf32>
    %32 = arith.addf %30, %31 : vector<16x8xf32>
    %33 = vector.extract_strided_slice %26 {offsets = [0, 16], sizes = [16, 8], strides = [1, 1]} : vector<16x24xf32> to vector<16x8xf32>
    %34 = vector.extract_strided_slice %33 {offsets = [1, 0], sizes = [15, 8], strides = [1, 1]} : vector<16x8xf32> to vector<15x8xf32>
    %35 = vector.extract_strided_slice %33 {offsets = [0, 0], sizes = [1, 8], strides = [1, 1]} : vector<16x8xf32> to vector<1x8xf32>
    %36 = tpu.concatenate %34, %35 in 0 : vector<15x8xf32>, vector<1x8xf32> -> vector<16x8xf32>
    %37 = arith.addf %32, %36 : vector<16x8xf32>
    %38 = arith.addf %25, %37 : vector<16x8xf32>
    %39 = vector.extract_strided_slice %2 {offsets = [16, 0], sizes = [16, 8], strides = [1, 1]} : vector<32x8xf32> to vector<16x8xf32>
    %40 = vector.extract_strided_slice %24 {offsets = [16, 0], sizes = [16, 24], strides = [1, 1]} : vector<64x24xf32> to vector<16x24xf32>
    %41 = vector.extract_strided_slice %40 {offsets = [0, 0], sizes = [16, 8], strides = [1, 1]} : vector<16x24xf32> to vector<16x8xf32>
    %42 = vector.extract_strided_slice %41 {offsets = [15, 0], sizes = [1, 8], strides = [1, 1]} : vector<16x8xf32> to vector<1x8xf32>
    %43 = vector.extract_strided_slice %41 {offsets = [0, 0], sizes = [15, 8], strides = [1, 1]} : vector<16x8xf32> to vector<15x8xf32>
    %44 = tpu.concatenate %42, %43 in 0 : vector<1x8xf32>, vector<15x8xf32> -> vector<16x8xf32>
    %45 = vector.extract_strided_slice %40 {offsets = [0, 8], sizes = [16, 8], strides = [1, 1]} : vector<16x24xf32> to vector<16x8xf32>
    %46 = arith.addf %44, %45 : vector<16x8xf32>
    %47 = vector.extract_strided_slice %40 {offsets = [0, 16], sizes = [16, 8], strides = [1, 1]} : vector<16x24xf32> to vector<16x8xf32>
    %48 = vector.extract_strided_slice %47 {offsets = [1, 0], sizes = [15, 8], strides = [1, 1]} : vector<16x8xf32> to vector<15x8xf32>
    %49 = vector.extract_strided_slice %47 {offsets = [0, 0], sizes = [1, 8], strides = [1, 1]} : vector<16x8xf32> to vector<1x8xf32>
    %50 = tpu.concatenate %48, %49 in 0 : vector<15x8xf32>, vector<1x8xf32> -> vector<16x8xf32>
    %51 = arith.addf %46, %50 : vector<16x8xf32>
    %52 = arith.addf %39, %51 : vector<16x8xf32>
    %53 = tpu.concatenate %38, %52 in 0 : vector<16x8xf32>, vector<16x8xf32> -> vector<32x8xf32>
    %54 = vector.extract_strided_slice %3 {offsets = [0, 0], sizes = [16, 8], strides = [1, 1]} : vector<32x8xf32> to vector<16x8xf32>
    %55 = vector.extract_strided_slice %24 {offsets = [32, 0], sizes = [16, 24], strides = [1, 1]} : vector<64x24xf32> to vector<16x24xf32>
    %56 = vector.extract_strided_slice %55 {offsets = [0, 0], sizes = [16, 8], strides = [1, 1]} : vector<16x24xf32> to vector<16x8xf32>
    %57 = vector.extract_strided_slice %56 {offsets = [15, 0], sizes = [1, 8], strides = [1, 1]} : vector<16x8xf32> to vector<1x8xf32>
    %58 = vector.extract_strided_slice %56 {offsets = [0, 0], sizes = [15, 8], strides = [1, 1]} : vector<16x8xf32> to vector<15x8xf32>
    %59 = tpu.concatenate %57, %58 in 0 : vector<1x8xf32>, vector<15x8xf32> -> vector<16x8xf32>
    %60 = vector.extract_strided_slice %55 {offsets = [0, 8], sizes = [16, 8], strides = [1, 1]} : vector<16x24xf32> to vector<16x8xf32>
    %61 = arith.addf %59, %60 : vector<16x8xf32>
    %62 = vector.extract_strided_slice %55 {offsets = [0, 16], sizes = [16, 8], strides = [1, 1]} : vector<16x24xf32> to vector<16x8xf32>
    %63 = vector.extract_strided_slice %62 {offsets = [1, 0], sizes = [15, 8], strides = [1, 1]} : vector<16x8xf32> to vector<15x8xf32>
    %64 = vector.extract_strided_slice %62 {offsets = [0, 0], sizes = [1, 8], strides = [1, 1]} : vector<16x8xf32> to vector<1x8xf32>
    %65 = tpu.concatenate %63, %64 in 0 : vector<15x8xf32>, vector<1x8xf32> -> vector<16x8xf32>
    %66 = arith.addf %61, %65 : vector<16x8xf32>
    %67 = arith.addf %54, %66 : vector<16x8xf32>
    %68 = vector.extract_strided_slice %3 {offsets = [16, 0], sizes = [16, 8], strides = [1, 1]} : vector<32x8xf32> to vector<16x8xf32>
    %69 = vector.extract_strided_slice %24 {offsets = [48, 0], sizes = [16, 24], strides = [1, 1]} : vector<64x24xf32> to vector<16x24xf32>
    %70 = vector.extract_strided_slice %69 {offsets = [0, 0], sizes = [16, 8], strides = [1, 1]} : vector<16x24xf32> to vector<16x8xf32>
    %71 = vector.extract_strided_slice %70 {offsets = [15, 0], sizes = [1, 8], strides = [1, 1]} : vector<16x8xf32> to vector<1x8xf32>
    %72 = vector.extract_strided_slice %70 {offsets = [0, 0], sizes = [15, 8], strides = [1, 1]} : vector<16x8xf32> to vector<15x8xf32>
    %73 = tpu.concatenate %71, %72 in 0 : vector<1x8xf32>, vector<15x8xf32> -> vector<16x8xf32>
    %74 = vector.extract_strided_slice %69 {offsets = [0, 8], sizes = [16, 8], strides = [1, 1]} : vector<16x24xf32> to vector<16x8xf32>
    %75 = arith.addf %73, %74 : vector<16x8xf32>
    %76 = vector.extract_strided_slice %69 {offsets = [0, 16], sizes = [16, 8], strides = [1, 1]} : vector<16x24xf32> to vector<16x8xf32>
    %77 = vector.extract_strided_slice %76 {offsets = [1, 0], sizes = [15, 8], strides = [1, 1]} : vector<16x8xf32> to vector<15x8xf32>
    %78 = vector.extract_strided_slice %76 {offsets = [0, 0], sizes = [1, 8], strides = [1, 1]} : vector<16x8xf32> to vector<1x8xf32>
    %79 = tpu.concatenate %77, %78 in 0 : vector<15x8xf32>, vector<1x8xf32> -> vector<16x8xf32>
    %80 = arith.addf %75, %79 : vector<16x8xf32>
    %81 = arith.addf %68, %80 : vector<16x8xf32>
    %82 = tpu.concatenate %67, %81 in 0 : vector<16x8xf32>, vector<16x8xf32> -> vector<32x8xf32>
    %cst_25 = arith.constant dense<0.000000e+00> : vector<32xf32>
    %83 = vector.multi_reduction <add>, %22, %cst_25 [1] : vector<32x32xf32> to vector<32xf32>
    %84 = vector.shape_cast %83 : vector<32xf32> to vector<32x1xf32>
    %cst_26 = arith.constant 3.200000e+01 : f32
    %85 = vector.broadcast %cst_26 : f32 to vector<32x1xf32>
    %86 = arith.divf %84, %85 : vector<32x1xf32>
    %87 = vector.broadcast %86 : vector<32x1xf32> to vector<32x32xf32>
    %88 = arith.subf %22, %87 : vector<32x32xf32>
    %89 = arith.mulf %88, %88 : vector<32x32xf32>
    %cst_27 = arith.constant dense<0.000000e+00> : vector<32xf32>
    %90 = vector.multi_reduction <add>, %89, %cst_27 [1] : vector<32x32xf32> to vector<32xf32>
    %91 = vector.shape_cast %90 : vector<32xf32> to vector<32x1xf32>
    %cst_28 = arith.constant 3.200000e+01 : f32
    %92 = vector.broadcast %cst_28 : f32 to vector<32x1xf32>
    %93 = arith.divf %91, %92 : vector<32x1xf32>
    %94 = vector.broadcast %86 : vector<32x1xf32> to vector<32x32xf32>
    %95 = arith.subf %22, %94 : vector<32x32xf32>
    %cst_29 = arith.constant 9.99999974E-6 : f32
    %96 = vector.broadcast %cst_29 : f32 to vector<32x1xf32>
    %97 = arith.addf %93, %96 : vector<32x1xf32>
    %98 = math.rsqrt %97 : vector<32x1xf32>
    %99 = vector.broadcast %98 : vector<32x1xf32> to vector<32x32xf32>
    %100 = arith.mulf %95, %99 : vector<32x32xf32>
    %c0_30 = arith.constant 0 : index
    %c0_31 = arith.constant 0 : index
    %101 = vector.load %arg11[%c0_30, %c0_31] : memref<1x32xf32, #tpu.memory_space<vmem>>, vector<1x32xf32>
    %102 = vector.broadcast %101 : vector<1x32xf32> to vector<32x32xf32>
    %103 = arith.mulf %100, %102 : vector<32x32xf32>
    %c0_32 = arith.constant 0 : index
    %c0_33 = arith.constant 0 : index
    %104 = vector.load %arg12[%c0_32, %c0_33] : memref<1x32xf32, #tpu.memory_space<vmem>>, vector<1x32xf32>
    %105 = vector.broadcast %104 : vector<1x32xf32> to vector<32x32xf32>
    %106 = arith.addf %103, %105 : vector<32x32xf32>
    %107 = vector.extract_strided_slice %106 {offsets = [0, 0], sizes = [16, 32], strides = [1, 1]} : vector<32x32xf32> to vector<16x32xf32>
    %108 = vector.extract_strided_slice %106 {offsets = [0, 0], sizes = [16, 32], strides = [1, 1]} : vector<32x32xf32> to vector<16x32xf32>
    %cst_34 = arith.constant dense<0.000000e+00> : vector<32xf32>
    %109 = vector.multi_reduction <add>, %108, %cst_34 [0] : vector<16x32xf32> to vector<32xf32>
    %110 = vector.shape_cast %109 : vector<32xf32> to vector<1x32xf32>
    %cst_35 = arith.constant 1.600000e+01 : f32
    %111 = vector.broadcast %cst_35 : f32 to vector<1x32xf32>
    %112 = arith.divf %110, %111 : vector<1x32xf32>
    %113 = vector.broadcast %112 : vector<1x32xf32> to vector<16x32xf32>
    %114 = arith.subf %107, %113 : vector<16x32xf32>
    %115 = vector.extract_strided_slice %106 {offsets = [16, 0], sizes = [16, 32], strides = [1, 1]} : vector<32x32xf32> to vector<16x32xf32>
    %116 = vector.extract_strided_slice %106 {offsets = [16, 0], sizes = [16, 32], strides = [1, 1]} : vector<32x32xf32> to vector<16x32xf32>
    %cst_36 = arith.constant dense<0.000000e+00> : vector<32xf32>
    %117 = vector.multi_reduction <add>, %116, %cst_36 [0] : vector<16x32xf32> to vector<32xf32>
    %118 = vector.shape_cast %117 : vector<32xf32> to vector<1x32xf32>
    %cst_37 = arith.constant 1.600000e+01 : f32
    %119 = vector.broadcast %cst_37 : f32 to vector<1x32xf32>
    %120 = arith.divf %118, %119 : vector<1x32xf32>
    %121 = vector.broadcast %120 : vector<1x32xf32> to vector<16x32xf32>
    %122 = arith.subf %115, %121 : vector<16x32xf32>
    %123 = tpu.concatenate %114, %122 in 0 : vector<16x32xf32>, vector<16x32xf32> -> vector<32x32xf32>
    %c0_38 = arith.constant 0 : index
    %c0_39 = arith.constant 0 : index
    %124 = vector.load %arg13[%c0_38, %c0_39] : memref<32x8xf32, #tpu.memory_space<vmem>>, vector<32x8xf32>
    %cst_40 = arith.constant dense<0.000000e+00> : vector<32x8xf32>
    %125 = tpu.matmul %123, %124, %cst_40 {dimension_numbers = #tpu.dot_dimension_numbers<[1], [0], [0], [1], [0, 0, 1, 1], [], []>} : vector<32x32xf32>, vector<32x8xf32>, vector<32x8xf32> -> vector<32x8xf32>
    %c0_41 = arith.constant 0 : index
    %c0_42 = arith.constant 0 : index
    %126 = vector.load %arg14[%c0_41, %c0_42] : memref<1x8xf32, #tpu.memory_space<vmem>>, vector<1x8xf32>
    %127 = vector.broadcast %126 : vector<1x8xf32> to vector<32x8xf32>
    %128 = arith.addf %125, %127 : vector<32x8xf32>
    %129 = vector.extract_strided_slice %53 {offsets = [0, 0], sizes = [16, 8], strides = [1, 1]} : vector<32x8xf32> to vector<16x8xf32>
    %cst_43 = arith.constant dense<0.000000e+00> : vector<8xf32>
    %130 = vector.multi_reduction <add>, %129, %cst_43 [0] : vector<16x8xf32> to vector<8xf32>
    %131 = vector.shape_cast %130 : vector<8xf32> to vector<1x8xf32>
    %cst_44 = arith.constant 1.600000e+01 : f32
    %132 = vector.broadcast %cst_44 : f32 to vector<1x8xf32>
    %133 = arith.divf %131, %132 : vector<1x8xf32>
    %134 = vector.extract_strided_slice %53 {offsets = [16, 0], sizes = [16, 8], strides = [1, 1]} : vector<32x8xf32> to vector<16x8xf32>
    %cst_45 = arith.constant dense<0.000000e+00> : vector<8xf32>
    %135 = vector.multi_reduction <add>, %134, %cst_45 [0] : vector<16x8xf32> to vector<8xf32>
    %136 = vector.shape_cast %135 : vector<8xf32> to vector<1x8xf32>
    %cst_46 = arith.constant 1.600000e+01 : f32
    %137 = vector.broadcast %cst_46 : f32 to vector<1x8xf32>
    %138 = arith.divf %136, %137 : vector<1x8xf32>
    %139 = tpu.concatenate %133, %138 in 0 : vector<1x8xf32>, vector<1x8xf32> -> vector<2x8xf32>
    %c0_47 = arith.constant 0 : index
    %c0_48 = arith.constant 0 : index
    %140 = vector.load %arg15[%c0_47, %c0_48] : memref<8x2xf32, #tpu.memory_space<vmem>>, vector<8x2xf32>
    %c0_49 = arith.constant 0 : index
    %c0_50 = arith.constant 0 : index
    %141 = vector.load %arg16[%c0_49, %c0_50] : memref<1x2xf32, #tpu.memory_space<vmem>>, vector<1x2xf32>
    %c0_51 = arith.constant 0 : index
    %c0_52 = arith.constant 0 : index
    %142 = vector.load %arg17[%c0_51, %c0_52] : memref<2x8xf32, #tpu.memory_space<vmem>>, vector<2x8xf32>
    %c0_53 = arith.constant 0 : index
    %c0_54 = arith.constant 0 : index
    %143 = vector.load %arg18[%c0_53, %c0_54] : memref<1x8xf32, #tpu.memory_space<vmem>>, vector<1x8xf32>
    %cst_55 = arith.constant dense<0.000000e+00> : vector<2x2xf32>
    %144 = tpu.matmul %139, %140, %cst_55 {dimension_numbers = #tpu.dot_dimension_numbers<[1], [0], [0], [1], [0, 0, 1, 1], [], []>} : vector<2x8xf32>, vector<8x2xf32>, vector<2x2xf32> -> vector<2x2xf32>
    %145 = vector.broadcast %141 : vector<1x2xf32> to vector<2x2xf32>
    %146 = arith.addf %144, %145 : vector<2x2xf32>
    %cst_56 = arith.constant 0.000000e+00 : f32
    %147 = vector.broadcast %cst_56 : f32 to vector<2x2xf32>
    %148 = arith.maximumf %146, %147 : vector<2x2xf32>
    %cst_57 = arith.constant dense<0.000000e+00> : vector<2x8xf32>
    %149 = tpu.matmul %148, %142, %cst_57 {dimension_numbers = #tpu.dot_dimension_numbers<[1], [0], [0], [1], [0, 0, 1, 1], [], []>} : vector<2x2xf32>, vector<2x8xf32>, vector<2x8xf32> -> vector<2x8xf32>
    %150 = vector.broadcast %143 : vector<1x8xf32> to vector<2x8xf32>
    %151 = arith.addf %149, %150 : vector<2x8xf32>
    %152 = arith.negf %151 : vector<2x8xf32>
    %153 = math.exp %152 : vector<2x8xf32>
    %cst_58 = arith.constant 1.000000e+00 : f32
    %154 = vector.broadcast %cst_58 : f32 to vector<2x8xf32>
    %155 = arith.addf %154, %153 : vector<2x8xf32>
    %156 = arith.divf %154, %155 : vector<2x8xf32>
    %157 = vector.extract_strided_slice %82 {offsets = [0, 0], sizes = [16, 8], strides = [1, 1]} : vector<32x8xf32> to vector<16x8xf32>
    %cst_59 = arith.constant dense<0.000000e+00> : vector<8xf32>
    %158 = vector.multi_reduction <add>, %157, %cst_59 [0] : vector<16x8xf32> to vector<8xf32>
    %159 = vector.shape_cast %158 : vector<8xf32> to vector<1x8xf32>
    %cst_60 = arith.constant 1.600000e+01 : f32
    %160 = vector.broadcast %cst_60 : f32 to vector<1x8xf32>
    %161 = arith.divf %159, %160 : vector<1x8xf32>
    %162 = vector.extract_strided_slice %82 {offsets = [16, 0], sizes = [16, 8], strides = [1, 1]} : vector<32x8xf32> to vector<16x8xf32>
    %cst_61 = arith.constant dense<0.000000e+00> : vector<8xf32>
    %163 = vector.multi_reduction <add>, %162, %cst_61 [0] : vector<16x8xf32> to vector<8xf32>
    %164 = vector.shape_cast %163 : vector<8xf32> to vector<1x8xf32>
    %cst_62 = arith.constant 1.600000e+01 : f32
    %165 = vector.broadcast %cst_62 : f32 to vector<1x8xf32>
    %166 = arith.divf %164, %165 : vector<1x8xf32>
    %167 = tpu.concatenate %161, %166 in 0 : vector<1x8xf32>, vector<1x8xf32> -> vector<2x8xf32>
    %c0_63 = arith.constant 0 : index
    %c0_64 = arith.constant 0 : index
    %168 = vector.load %arg19[%c0_63, %c0_64] : memref<8x2xf32, #tpu.memory_space<vmem>>, vector<8x2xf32>
    %c0_65 = arith.constant 0 : index
    %c0_66 = arith.constant 0 : index
    %169 = vector.load %arg20[%c0_65, %c0_66] : memref<1x2xf32, #tpu.memory_space<vmem>>, vector<1x2xf32>
    %c0_67 = arith.constant 0 : index
    %c0_68 = arith.constant 0 : index
    %170 = vector.load %arg21[%c0_67, %c0_68] : memref<2x8xf32, #tpu.memory_space<vmem>>, vector<2x8xf32>
    %c0_69 = arith.constant 0 : index
    %c0_70 = arith.constant 0 : index
    %171 = vector.load %arg22[%c0_69, %c0_70] : memref<1x8xf32, #tpu.memory_space<vmem>>, vector<1x8xf32>
    %cst_71 = arith.constant dense<0.000000e+00> : vector<2x2xf32>
    %172 = tpu.matmul %167, %168, %cst_71 {dimension_numbers = #tpu.dot_dimension_numbers<[1], [0], [0], [1], [0, 0, 1, 1], [], []>} : vector<2x8xf32>, vector<8x2xf32>, vector<2x2xf32> -> vector<2x2xf32>
    %173 = vector.broadcast %169 : vector<1x2xf32> to vector<2x2xf32>
    %174 = arith.addf %172, %173 : vector<2x2xf32>
    %cst_72 = arith.constant 0.000000e+00 : f32
    %175 = vector.broadcast %cst_72 : f32 to vector<2x2xf32>
    %176 = arith.maximumf %174, %175 : vector<2x2xf32>
    %cst_73 = arith.constant dense<0.000000e+00> : vector<2x8xf32>
    %177 = tpu.matmul %176, %170, %cst_73 {dimension_numbers = #tpu.dot_dimension_numbers<[1], [0], [0], [1], [0, 0, 1, 1], [], []>} : vector<2x2xf32>, vector<2x8xf32>, vector<2x8xf32> -> vector<2x8xf32>
    %178 = vector.broadcast %171 : vector<1x8xf32> to vector<2x8xf32>
    %179 = arith.addf %177, %178 : vector<2x8xf32>
    %180 = arith.negf %179 : vector<2x8xf32>
    %181 = math.exp %180 : vector<2x8xf32>
    %cst_74 = arith.constant 1.000000e+00 : f32
    %182 = vector.broadcast %cst_74 : f32 to vector<2x8xf32>
    %183 = arith.addf %182, %181 : vector<2x8xf32>
    %184 = arith.divf %182, %183 : vector<2x8xf32>
    %185 = vector.extract_strided_slice %128 {offsets = [0, 0], sizes = [16, 8], strides = [1, 1]} : vector<32x8xf32> to vector<16x8xf32>
    %186 = vector.extract_strided_slice %53 {offsets = [0, 0], sizes = [16, 8], strides = [1, 1]} : vector<32x8xf32> to vector<16x8xf32>
    %187 = vector.extract_strided_slice %156 {offsets = [0, 0], sizes = [1, 8], strides = [1, 1]} : vector<2x8xf32> to vector<1x8xf32>
    %188 = vector.broadcast %187 : vector<1x8xf32> to vector<16x8xf32>
    %189 = arith.mulf %186, %188 : vector<16x8xf32>
    %190 = arith.addf %185, %189 : vector<16x8xf32>
    %191 = vector.extract_strided_slice %82 {offsets = [0, 0], sizes = [16, 8], strides = [1, 1]} : vector<32x8xf32> to vector<16x8xf32>
    %192 = vector.extract_strided_slice %184 {offsets = [0, 0], sizes = [1, 8], strides = [1, 1]} : vector<2x8xf32> to vector<1x8xf32>
    %193 = vector.broadcast %192 : vector<1x8xf32> to vector<16x8xf32>
    %194 = arith.mulf %191, %193 : vector<16x8xf32>
    %195 = arith.addf %190, %194 : vector<16x8xf32>
    %196 = vector.extract_strided_slice %128 {offsets = [16, 0], sizes = [16, 8], strides = [1, 1]} : vector<32x8xf32> to vector<16x8xf32>
    %197 = vector.extract_strided_slice %53 {offsets = [16, 0], sizes = [16, 8], strides = [1, 1]} : vector<32x8xf32> to vector<16x8xf32>
    %198 = vector.extract_strided_slice %156 {offsets = [1, 0], sizes = [1, 8], strides = [1, 1]} : vector<2x8xf32> to vector<1x8xf32>
    %199 = vector.broadcast %198 : vector<1x8xf32> to vector<16x8xf32>
    %200 = arith.mulf %197, %199 : vector<16x8xf32>
    %201 = arith.addf %196, %200 : vector<16x8xf32>
    %202 = vector.extract_strided_slice %82 {offsets = [16, 0], sizes = [16, 8], strides = [1, 1]} : vector<32x8xf32> to vector<16x8xf32>
    %203 = vector.extract_strided_slice %184 {offsets = [1, 0], sizes = [1, 8], strides = [1, 1]} : vector<2x8xf32> to vector<1x8xf32>
    %204 = vector.broadcast %203 : vector<1x8xf32> to vector<16x8xf32>
    %205 = arith.mulf %202, %204 : vector<16x8xf32>
    %206 = arith.addf %201, %205 : vector<16x8xf32>
    %207 = tpu.concatenate %195, %206 in 0 : vector<16x8xf32>, vector<16x8xf32> -> vector<32x8xf32>
    %c0_75 = arith.constant 0 : index
    %c0_76 = arith.constant 0 : index
    %208 = vector.load %arg23[%c0_75, %c0_76] : memref<32x8xf32, #tpu.memory_space<vmem>>, vector<32x8xf32>
    tpu.vector_store %arg23[%c0_75, %c0_76], %207 {strides = array<i32>} : memref<32x8xf32, #tpu.memory_space<vmem>>, vector<32x8xf32>,
    return
  }
  func.func @transform_0(%arg0: i32) -> (i32, i32) {
    %c0_i32 = arith.constant 0 : i32
    %c0_i32_0 = arith.constant 0 : i32
    %c0_i32_1 = arith.constant 0 : i32
    return %c0_i32, %c0_i32_0 : i32, i32
  }
  func.func @transform_1(%arg0: i32) -> (i32, i32) {
    %c0_i32 = arith.constant 0 : i32
    %c0_i32_0 = arith.constant 0 : i32
    %c0_i32_1 = arith.constant 0 : i32
    return %c0_i32, %c0_i32_0 : i32, i32
  }
  func.func @transform_2(%arg0: i32) -> (i32, i32) {
    %c0_i32 = arith.constant 0 : i32
    %c0_i32_0 = arith.constant 0 : i32
    %c0_i32_1 = arith.constant 0 : i32
    return %c0_i32, %c0_i32_0 : i32, i32
  }
  func.func @transform_3(%arg0: i32) -> (i32, i32) {
    %c0_i32 = arith.constant 0 : i32
    %c0_i32_0 = arith.constant 0 : i32
    %c0_i32_1 = arith.constant 0 : i32
    return %c0_i32, %c0_i32_0 : i32, i32
  }
  func.func @transform_4(%arg0: i32) -> (i32, i32) {
    %c0_i32 = arith.constant 0 : i32
    %c0_i32_0 = arith.constant 0 : i32
    %c0_i32_1 = arith.constant 0 : i32
    return %c0_i32, %c0_i32_0 : i32, i32
  }
  func.func @transform_5(%arg0: i32) -> (i32, i32) {
    %c0_i32 = arith.constant 0 : i32
    %c0_i32_0 = arith.constant 0 : i32
    %c0_i32_1 = arith.constant 0 : i32
    return %c0_i32, %c0_i32_0 : i32, i32
  }
  func.func @transform_6(%arg0: i32) -> (i32, i32) {
    %c0_i32 = arith.constant 0 : i32
    %c0_i32_0 = arith.constant 0 : i32
    %c0_i32_1 = arith.constant 0 : i32
    return %c0_i32, %c0_i32_0 : i32, i32
  }
  func.func @transform_7(%arg0: i32) -> (i32, i32) {
    %c0_i32 = arith.constant 0 : i32
    %c0_i32_0 = arith.constant 0 : i32
    %c0_i32_1 = arith.constant 0 : i32
    return %c0_i32, %c0_i32_0 : i32, i32
  }
  func.func @transform_8(%arg0: i32) -> (i32, i32) {
    %c0_i32 = arith.constant 0 : i32
    %c0_i32_0 = arith.constant 0 : i32
    %c0_i32_1 = arith.constant 0 : i32
    return %c0_i32, %c0_i32_0 : i32, i32
  }
  func.func @transform_9(%arg0: i32) -> (i32, i32) {
    %c0_i32 = arith.constant 0 : i32
    %c0_i32_0 = arith.constant 0 : i32
    %c0_i32_1 = arith.constant 0 : i32
    return %c0_i32, %c0_i32_0 : i32, i32
  }
  func.func @transform_10(%arg0: i32) -> (i32, i32) {
    %c0_i32 = arith.constant 0 : i32
    %c0_i32_0 = arith.constant 0 : i32
    %c0_i32_1 = arith.constant 0 : i32
    return %c0_i32, %c0_i32_0 : i32, i32
  }
  func.func @transform_11(%arg0: i32) -> (i32, i32) {
    %c0_i32 = arith.constant 0 : i32
    %c0_i32_0 = arith.constant 0 : i32
    %c0_i32_1 = arith.constant 0 : i32
    return %c0_i32, %c0_i32_0 : i32, i32
  }
  func.func @transform_12(%arg0: i32) -> (i32, i32) {
    %c0_i32 = arith.constant 0 : i32
    %c0_i32_0 = arith.constant 0 : i32
    %c0_i32_1 = arith.constant 0 : i32
    return %c0_i32, %c0_i32_0 : i32, i32
  }
  func.func @transform_13(%arg0: i32) -> (i32, i32) {
    %c0_i32 = arith.constant 0 : i32
    %c0_i32_0 = arith.constant 0 : i32
    %c0_i32_1 = arith.constant 0 : i32
    return %c0_i32, %c0_i32_0 : i32, i32
  }
  func.func @transform_14(%arg0: i32) -> (i32, i32) {
    %c0_i32 = arith.constant 0 : i32
    %c0_i32_0 = arith.constant 0 : i32
    %c0_i32_1 = arith.constant 0 : i32
    return %c0_i32, %c0_i32_0 : i32, i32
  }
  func.func @transform_15(%arg0: i32) -> (i32, i32) {
    %c0_i32 = arith.constant 0 : i32
    %c0_i32_0 = arith.constant 0 : i32
    %c0_i32_1 = arith.constant 0 : i32
    return %c0_i32, %c0_i32_0 : i32, i32
  }
  func.func @transform_16(%arg0: i32) -> (i32, i32) {
    %c0_i32 = arith.constant 0 : i32
    %c0_i32_0 = arith.constant 0 : i32
    %c0_i32_1 = arith.constant 0 : i32
    return %c0_i32, %c0_i32_0 : i32, i32
  }
  func.func @transform_17(%arg0: i32) -> (i32, i32) {
    %c0_i32 = arith.constant 0 : i32
    %c0_i32_0 = arith.constant 0 : i32
    %c0_i32_1 = arith.constant 0 : i32
    return %c0_i32, %c0_i32_0 : i32, i32
  }
  func.func @transform_18(%arg0: i32) -> (i32, i32) {
    %c0_i32 = arith.constant 0 : i32
    %c0_i32_0 = arith.constant 0 : i32
    %c0_i32_1 = arith.constant 0 : i32
    return %c0_i32, %c0_i32_0 : i32, i32
  }
  func.func @transform_19(%arg0: i32) -> (i32, i32) {
    %c0_i32 = arith.constant 0 : i32
    %c0_i32_0 = arith.constant 0 : i32
    %c0_i32_1 = arith.constant 0 : i32
    return %c0_i32, %c0_i32_0 : i32, i32
  }
  func.func @transform_20(%arg0: i32) -> (i32, i32) {
    %c0_i32 = arith.constant 0 : i32
    %c0_i32_0 = arith.constant 0 : i32
    %c0_i32_1 = arith.constant 0 : i32
    return %c0_i32, %c0_i32_0 : i32, i32
  }
  func.func @transform_21(%arg0: i32) -> (i32, i32) {
    %c0_i32 = arith.constant 0 : i32
    %c0_i32_0 = arith.constant 0 : i32
    %c0_i32_1 = arith.constant 0 : i32
    return %c0_i32, %c0_i32_0 : i32, i32
  }
  func.func @transform_22(%arg0: i32) -> (i32, i32) {
    %c0_i32 = arith.constant 0 : i32
    %c0_i32_0 = arith.constant 0 : i32
    %c0_i32_1 = arith.constant 0 : i32
    return %c0_i32, %c0_i32_0 : i32, i32
  }
}

</mosaic_0001>

<bundles_post_ra>
// kernel: reverse.0
= control target key start
LH: loop header
LB: loop body
LE: loop exit
PB: predicated region body
PF: predicated region fallthrough
CT: control target
= control target key end

     0   :  { %v2_v0 = vlaneseq  ;;  %s240_s0 = inlined_call_operand.vmem [shape: f32[2,4,8,7], index: 0, kind: input, shape index: {}]   ;;  %s241_s1 = inlined_call_operand.vmem [shape: f32[2,4,8,7], index: 1, kind: output, shape index: {}]  }
   0x1   :  { %v51_v2 = vld [vmem:[%s240_s0 + $0x10] sm:$0xff]  ;;  %v47_v3 = vld [vmem:[%s240_s0] sm:$0xff]  ;;  %v53_v4 = vld [vmem:[%s240_s0 + $0x18] sm:$0xff] }
   0x2   :  { %v3_v1 = vsub.s32 6, %v2_v0  ;;  %v49_v5 = vld [vmem:[%s240_s0 + $0x8] sm:$0xff]  ;;  %v55_v7 = vld [vmem:[%s240_s0 + $0x20] sm:$0xff]  ;;  %v61_v8 = vld [vmem:[%s240_s0 + $0x38] sm:$0xff] }
   0x3   :  { %v57_v6 = vld [vmem:[%s240_s0 + $0x28] sm:$0xff]  ;;  %v59_v9 = vld [vmem:[%s240_s0 + $0x30] sm:$0xff] }
   0x4   :  { %4 = vset.pattern.permute.xlu0 %v3_v1  ;;  %181 = vset.pattern.permute.xlu1 %v3_v1 }
   0x5   :  { %79 = vperm.xlu1 %181, %v51_v2   ;;  %67 = vperm.xlu0 %4, %v47_v3  }
   0x9   :  { %85 = vperm.xlu1 %181, %v53_v4   ;;  %73 = vperm.xlu0 %4, %v49_v5  }
   0xd   :  { %97 = vperm.xlu1 %181, %v57_v6   ;;  %91 = vperm.xlu0 %4, %v55_v7  }
  0x11   :  { %109 = vperm.xlu1 %181, %v61_v8   ;;  %103 = vperm.xlu0 %4, %v59_v9  }
  0x80   :  { %v80_v10 = vpop.permute.xlu1 %79  ;;  %v68_v11 = vpop.permute.xlu0 %67 }
  0x81   :  { %159 = vst [vmem:[%s241_s1 + $0x10] sm:$0xff] %v80_v10  ;;  %155 = vst [vmem:[%s241_s1] sm:$0xff] %v68_v11 }
  0x84   :  { %v86_v12 = vpop.permute.xlu1 %85  ;;  %v74_v13 = vpop.permute.xlu0 %73 }
  0x85   :  { %161 = vst [vmem:[%s241_s1 + $0x18] sm:$0xff] %v86_v12  ;;  %157 = vst [vmem:[%s241_s1 + $0x8] sm:$0xff] %v74_v13 }
  0x88   :  { %v98_v14 = vpop.permute.xlu1 %97  ;;  %v92_v15 = vpop.permute.xlu0 %91 }
  0x89   :  { %165 = vst [vmem:[%s241_s1 + $0x28] sm:$0xff] %v98_v14  ;;  %163 = vst [vmem:[%s241_s1 + $0x20] sm:$0xff] %v92_v15 }
  0x8c   :  { %v110_v16 = vpop.permute.xlu1 %109  ;;  %v104_v17 = vpop.permute.xlu0 %103 }
  0x8d   :  { %169 = vst [vmem:[%s241_s1 + $0x38] sm:$0xff] %v110_v16  ;;  %167 = vst [vmem:[%s241_s1 + $0x30] sm:$0xff] %v104_v17 }

// kernel: _lambda_.2
= control target key start
LH: loop header
LB: loop body
LE: loop exit
PB: predicated region body
PF: predicated region fallthrough
CT: control target
= control target key end

     0   :  { %13 = vsyncpa [#allocation4], 0  ;;  %s1390_s0 = inlined_call_operand.vmem [shape: f32[2,16], index: 0, kind: input, shape index: {}]   ;;  %s1391_s1 = inlined_call_operand.hbm [shape: f32[16,16,32], index: 1, kind: input, shape index: {}]   ;;  %s1392_s2 = inlined_call_operand.hbm [shape: f32[16,32], index: 2, kind: input, shape index: {}]   ;;  %s1393_s3 = inlined_call_operand.vmem [shape: f32[32,96], index: 3, kind: input, shape index: {}]   ;;  %s1394_s4 = inlined_call_operand.hbm [shape: f32[32,96], index: 4, kind: input, shape index: {}]   ;;  %s1395_s5 = inlined_call_operand.vmem [shape: f32[1,96], index: 5, kind: input, shape index: {}]   ;;  %s1396_s6 = inlined_call_operand.vmem [shape: f32[32,32], index: 6, kind: output, shape index: {0}]   ;;  %s1397_s7 = inlined_call_operand.vmem [shape: f32[32,96], index: 7, kind: output, shape index: {1}]  }
   0x1   :  { %14 = vsyncpa [#allocation3], 0 }
   0x2   :  { %15 = vsyncpa [#allocation7], 0  ;;  %s22_s26 = sshll.u32 %s1390_s0, 4  ;;  %s974_s27 = smov [#allocation6]   ;;  %s23_s26 = int_to_ptr.vmem [resolvable:$true] %s22_s26 }
   0x3   :  { %s43_s28 = sshll.u32 %s974_s27, 4  ;;  %s44_s28 = int_to_ptr.vmem [resolvable:$true] %s43_s28 }
   0x4   :  { %s904_s29 = scalar_lea.vmem %s44_s28, 256  ;;  %p909_p1 = scmp.lt.s32.totalorder %s44_s28, %s44_s28 }
   0x5   :  { %p905_p0 = scmp.ne.s32.totalorder %s44_s28, %s904_s29  ;;  %p910_p2 = scmp.lt.s32.totalorder %s904_s29, %s904_s29 }
   0x7   :  { %p911_p3 = por %p910_p2, %p909_p1 }
   0x9   :  { %p912_p4 = pnand %p911_p3, %p905_p0 }
   0xb   :  { %915 = shalt.err (!%p912_p4)
}
   0xc   :  { %s975_s30 = smov 128   ;;  %s976_s8 = smov 8  }
   0xd   :  { %49 = dma.hbm_to_vmem [thread:$0]  %s1392_s2, 256, %s44_s28, [#allocation7], %s975_s30, %s975_s30, %s976_s8  }
   0xe   :  { %s916_s0 = scalar_lea.vmem %s23_s26, 32  ;;  %p921_p6 = scmp.lt.s32.totalorder %s23_s26, %s23_s26 }
   0xf   :  { %p917_p5 = scmp.ne.s32.totalorder %s23_s26, %s916_s0  ;;  %p922_p7 = scmp.lt.s32.totalorder %s916_s0, %s916_s0 }
  0x11   :  { %p923_p8 = por %p922_p7, %p921_p6 }
  0x13   :  { %p924_p9 = pnand %p923_p8, %p917_p5 }
  0x15   :  { %927 = shalt.err (!%p924_p9)
}
  0x16   :  { %s977_s11 = smov [#allocation2]   ;;  %s978_s12 = smov [#allocation5]  }
  0x17   :  { %25 = dma.vmem_to_smem %s23_s26, 32, %s977_s11, [#allocation4]  }
  0x18   :  { %s31_s13 = sshll.u32 %s978_s12, 4  ;;  %s979_s14 = smov [#allocation8]   ;;  %s32_s13 = int_to_ptr.vmem [resolvable:$true] %s31_s13 }
  0x19   :  { %s57_s15 = sshll.u32 %s979_s14, 4  ;;  %s936_s16 = scalar_lea.vmem %s32_s13, 4096  ;;  %s58_s15 = int_to_ptr.vmem [resolvable:$true] %s57_s15 }
  0x1a   :  { %p937_p10 = scmp.ne.s32.totalorder %s32_s13, %s936_s16  ;;  %p941_p11 = scmp.lt.s32.totalorder %s32_s13, %s32_s13 }
  0x1b   :  { %p942_p12 = scmp.lt.s32.totalorder %s936_s16, %s936_s16 }
  0x1d   :  { %p943_p13 = por %p942_p12, %p941_p11 }
  0x1f   :  { %p944_p0 = pnand %p943_p13, %p937_p10 }
  0x21   :  { %947 = shalt.err (!%p944_p0)
}
  0x22   :  { %37 = dma.hbm_to_vmem [thread:$0]  %s1391_s1, 4096, %s32_s13, [#allocation3], %s975_s30, %s975_s30, %s976_s8  }
  0x23   :  { %s956_s18 = scalar_lea.vmem %s58_s15, 512  ;;  %p961_p2 = scmp.lt.s32.totalorder %s58_s15, %s58_s15 }
  0x24   :  { %p957_p1 = scmp.ne.s32.totalorder %s58_s15, %s956_s18  ;;  %p962_p3 = scmp.lt.s32.totalorder %s956_s18, %s956_s18 }
  0x26   :  { %p963_p4 = por %p962_p3, %p961_p2 }
  0x28   :  { %p964_p5 = pnand %p963_p4, %p957_p1 }
  0x2a   :  { %967 = shalt.err (!%p964_p5)
}
  0x2b   :  { %63 = dma.hbm_to_vmem [thread:$0]  %s1394_s4, 512, %s58_s15, [#allocation7], %s975_s30, %s975_s30, %s976_s8  }
  0x2c   :  { %968 = dma.done.wait [#allocation4], 32  }
  0x2d   :  { %969 = vsyncadd [#allocation4], 4294967264 }
  0x2e   :  { %970 = dma.done.wait [#allocation3], 4096  }
  0x2f   :  { %971 = vsyncadd [#allocation3], 4294963200 }
  0x30   :  { %972 = dma.done.wait [#allocation7], 768  }
  0x31   :  { %973 = vsyncadd [#allocation7], 4294966528 }
  0x32   :  { %78 = sfence }
  0x33   :  { %v1046_v0 = vld [vmem:[%s1393_s3 + $0x18] sm:$0xff]  ;;  %v1051_v1 = vld [vmem:[%s1393_s3 + $0x10] sm:$0xff]  ;;  %s1053_s24 = sld [smem:[#allocation2]]  ;;  %v1062_v2 = vld [vmem:[%s1393_s3 + $0x8] sm:$0xff]  ;;  %vm233_vm0 = vcmask 261120   ;;  %vm333_vm1 = vcmask 1046528  }
  0x34   :  { %844 = vmatprep.subr.mxu0 %v1046_v0  ;;  %s1056_s4 = sld [smem:[#allocation2 + $0x1]]  ;;  %v1073_v3 = vld [vmem:[%s1393_s3] sm:$0xff]  ;;  %v1080_v5 = vld [vmem:[#allocation5 + $0x10] sm:$0xff]  ;;  %v1093_v9 = vld [vmem:[#allocation5 + $0x8] sm:$0xff]  ;;  %vm319_vm2 = vcmask 1040384   ;;  %vm438_vm3 = vcmask 785408  }
  0x35   :  { %845 = vmatpush3.msra.mxu0 %v1046_v0  ;;  %s1064_s27 = sld [smem:[#allocation2 + $0x2]]  ;;  %v1075_v4 = vld [vmem:[#allocation5] sm:$0xff]  ;;  %v1100_v14 = vld [vmem:[#allocation5 + $0x30] sm:$0xff]  ;;  %v1105_v16 = vld [vmem:[#allocation5 + $0x18] sm:$0xff] }
  0x36   :  { %846 = vmatprep.subr.mxu0 %v1051_v1  ;;  %s1067_s28 = sld [smem:[#allocation2 + $0x3]]  ;;  %v1085_v6 = vld [vmem:[#allocation6] sm:$0xff]  ;;  %v1118_v23 = vld [vmem:[#allocation5 + $0x28] sm:$0xff]  ;;  %v1124_v26 = vld [vmem:[#allocation5 + $0x50] sm:$0xff] }
  0x37   :  { %847 = vmatpush3.msra.mxu0 %v1051_v1  ;;  %s1077_s8 = sld [smem:[#allocation2 + $0x4]]  ;;  %v1088_v8 = vld [vmem:[#allocation5 + $0x20] sm:$0xff]  ;;  %v1129_v28 = vld [vmem:[#allocation6 + $0x8] sm:$0xff]  ;;  %v1131_v30 = vld [vmem:[#allocation5 + $0x38] sm:$0xff] }
  0x38   :  { %848 = vmatprep.subr.mxu0 %v1062_v2  ;;  %s1082_s9 = sld [smem:[#allocation2 + $0x5]]  ;;  %v1113_v20 = vld [vmem:[#allocation5 + $0x40] sm:$0xff]  ;;  %v1143_v37 = vld [vmem:[#allocation5 + $0x48] sm:$0xff]  ;;  %v1149_v40 = vld [vmem:[#allocation5 + $0x70] sm:$0xff] }
  0x39   :  { %849 = vmatpush3.msra.mxu0 %v1062_v2  ;;  %v93_v7 = vstv %s1053_s24  ;;  %s1090_s3 = sld [smem:[#allocation2 + $0x6]]  ;;  %v1137_v33 = vld [vmem:[#allocation5 + $0x60] sm:$0xff]  ;;  %v1154_v44 = vld [vmem:[#allocation5 + $0x58] sm:$0xff]  ;;  %v1160_v47 = vld [vmem:[#allocation5 + $0x68] sm:$0xff] }
  0x3a   :  { %850 = vmatprep.subr.mxu0 %v1073_v3  ;;  %v94_v10 = vmul.f32 %v93_v7, %v1075_v4  ;;  %v102_v11 = vstv %s1056_s4  ;;  %s1102_s10 = sld [smem:[#allocation2 + $0x7]]  ;;  %v95_v19 = vmul.f32 %v93_v7, %v1093_v9  ;;  %v1162_v48 = vld [vmem:[#allocation5 + $0x78] sm:$0xff]  ;;  %v1164_v49 = vld [vmem:[#allocation5 + $0x80] sm:$0xff]  ;;  %v1170_v54 = vld [vmem:[#allocation5 + $0x88] sm:$0xff] }
  0x3b   :  { %851 = vmatpush3.msra.mxu0 %v1073_v3  ;;  %v103_v12 = vmul.f32 %v102_v11, %v1080_v5  ;;  %v111_v13 = vstv %s1064_s27  ;;  %s1109_s0 = sld [smem:[#allocation2 + $0x8]]  ;;  %v104_v25 = vmul.f32 %v102_v11, %v1105_v16  ;;  %v1172_v55 = vld [vmem:[#allocation5 + $0x90] sm:$0xff]  ;;  %v1178_v58 = vld [vmem:[#allocation5 + $0xa0] sm:$0xff] }
  0x3c   :  { %v96_v15 = vadd.f32 %v94_v10, %v1085_v6  ;;  %v112_v17 = vmul.f32 %v111_v13, %v1088_v8  ;;  %v120_v18 = vstv %s1067_s28  ;;  %866 = vmatprep.subr.mxu0 %v1046_v0  ;;  %s1116_s11 = sld [smem:[#allocation2 + $0x9]]  ;;  %v113_v32 = vmul.f32 %v111_v13, %v1118_v23 }
  0x3d   :  { %v129_v21 = vstv %s1077_s8  ;;  %v121_v24 = vmul.f32 %v120_v18, %v1100_v14  ;;  %s1121_s12 = sld [smem:[#allocation2 + $0xa]]  ;;  %v97_v35 = vadd.f32 %v95_v19, %v1129_v28  ;;  %v122_v39 = vmul.f32 %v120_v18, %v1131_v30  ;;  %s980_s8 = smov 96  }
  0x3e   :  { %v105_v22 = vadd.f32 %v103_v12, %v96_v15  ;;  %v138_v27 = vstv %s1082_s9  ;;  %s1127_s13 = sld [smem:[#allocation2 + $0xb]]  ;;  %v130_v31 = vmul.f32 %v129_v21, %v1113_v20  ;;  %v131_v46 = vmul.f32 %v129_v21, %v1143_v37  ;;  %s981_s9 = smov 64  }
  0x3f   :  { %s1134_s14 = sld [smem:[#allocation2 + $0xc]]  ;;  %v147_v34 = vstv %s1090_s3  ;;  %v139_v38 = vmul.f32 %v138_v27, %v1124_v26  ;;  %v106_v42 = vadd.f32 %v104_v25, %v97_v35  ;;  %v140_v57 = vmul.f32 %v138_v27, %v1154_v44 }
  0x40   :  { %v114_v29 = vadd.f32 %v112_v17, %v105_v22  ;;  %s1140_s15 = sld [smem:[#allocation2 + $0xd]]  ;;  %v156_v41 = vstv %s1102_s10  ;;  %v148_v45 = vmul.f32 %v147_v34, %v1137_v33  ;;  %v149_v61 = vmul.f32 %v147_v34, %v1160_v47  ;;  %v1193_v17 = vld [vmem:[#allocation5 + $0x98] sm:$0xff]  ;;  %v1200_v22 = vld [vmem:[#allocation5 + $0xb0] sm:$0xff] }
  0x41   :  { %s1146_s16 = sld [smem:[#allocation2 + $0xe]]  ;;  %v165_v50 = vstv %s1109_s0  ;;  %v115_v51 = vadd.f32 %v113_v32, %v106_v42  ;;  %v157_v53 = vmul.f32 %v156_v41, %v1149_v40  ;;  %v158_v63 = vmul.f32 %v156_v41, %v1162_v48  ;;  %v1209_v32 = vld [vmem:[#allocation5 + $0xc0] sm:$0xff]  ;;  %v1221_v42 = vld [vmem:[#allocation5 + $0xa8] sm:$0xff] }
  0x42   :  { %v123_v36 = vadd.f32 %v121_v24, %v114_v29  ;;  %s1152_s2 = sld [smem:[#allocation2 + $0x80]]  ;;  %v174_v56 = vstv %s1116_s11  ;;  %v166_v7 = vmul.f32 %v165_v50, %v1164_v49  ;;  %v167_v10 = vmul.f32 %v165_v50, %v1170_v54  ;;  %v1230_v50 = vld [vmem:[#allocation5 + $0xd0] sm:$0xff] }
  0x43   :  { %s1157_s17 = sld [smem:[#allocation2 + $0x81]]  ;;  %v183_v59 = vstv %s1121_s12  ;;  %v124_v60 = vadd.f32 %v122_v39, %v115_v51  ;;  %v175_v11 = vmul.f32 %v174_v56, %v1172_v55 }
  0x44   :  { %v132_v43 = vadd.f32 %v130_v31, %v123_v36  ;;  %s1167_s18 = sld [smem:[#allocation2 + $0x82]]  ;;  %v184_v18 = vmul.f32 %v183_v59, %v1178_v58  ;;  %v192_v24 = vstv %s1127_s13  ;;  %v176_v36 = vmul.f32 %v174_v56, %v1193_v17 }
  0x45   :  { %s1175_s19 = sld [smem:[#allocation2 + $0x83]]  ;;  %v133_v12 = vadd.f32 %v131_v46, %v124_v60  ;;  %v201_v34 = vstv %s1134_s14 }
  0x46   :  { %v141_v52 = vadd.f32 %v139_v38, %v132_v43  ;;  %s1181_s20 = sld [smem:[#allocation2 + $0x84]]  ;;  %v1223_v43 = vld [vmem:[#allocation5 + $0xb8] sm:$0xff]  ;;  %v202_v46 = vmul.f32 %v201_v34, %v1209_v32  ;;  %v210_v51 = vstv %s1140_s15 }
  0x47   :  { %s1186_s1 = sld [smem:[#allocation2 + $0x85]]  ;;  %v142_v25 = vadd.f32 %v140_v57, %v133_v12  ;;  %v1236_v57 = vld [vmem:[#allocation5 + $0xe0] sm:$0xff]  ;;  %v219_v60 = vstv %s1146_s16 }
  0x48   :  { %v150_v62 = vadd.f32 %v148_v45, %v141_v52  ;;  %v446_v13 = vstv %s1152_s2  ;;  %s1191_s21 = sld [smem:[#allocation2 + $0x86]] }
  0x49   :  { %s1196_s22 = sld [smem:[#allocation2 + $0xf]]  ;;  %v447_v19 = vmul.f32 %v446_v13, %v1075_v4  ;;  %v454_v21 = vstv %s1157_s17  ;;  %v151_v38 = vadd.f32 %v149_v61, %v142_v25 }
  0x4a   :  { %v159_v15 = vadd.f32 %v157_v53, %v150_v62  ;;  %v455_v27 = vmul.f32 %v454_v21, %v1080_v5  ;;  %v462_v29 = vstv %s1167_s18  ;;  %s1207_s23 = sld [smem:[#allocation2 + $0x87]]  ;;  %v185_v62 = vmul.f32 %v183_v59, %v1221_v42  ;;  %v1254_v59 = vld [vmem:[#allocation5 + $0xf0] sm:$0xff] }
  0x4b   :  { %v449_v4 = vadd.f32 %v447_v19, %v1085_v6  ;;  %v463_v35 = vmul.f32 %v462_v29, %v1088_v8  ;;  %v470_v39 = vstv %s1175_s19  ;;  %s1219_s24 = sld [smem:[#allocation2 + $0x88]]  ;;  %v193_v6 = vmul.f32 %v192_v24, %v1200_v22 }
  0x4c   :  { %v168_v31 = vadd.f32 %v166_v7, %v159_v15  ;;  %v478_v5 = vstv %s1181_s20  ;;  %v471_v8 = vmul.f32 %v470_v39, %v1100_v14  ;;  %v160_v52 = vadd.f32 %v158_v63, %v151_v38  ;;  %s1234_s4 = sld [smem:[#allocation2 + $0x89]]  ;;  %v1247_v15 = vld [vmem:[#allocation5 + $0xc8] sm:$0xff] }
  0x4d   :  { %v457_v45 = vadd.f32 %v455_v27, %v449_v4  ;;  %v486_v53 = vstv %s1186_s1  ;;  %v479_v14 = vmul.f32 %v478_v5, %v1113_v20  ;;  %v194_v7 = vmul.f32 %v192_v24, %v1223_v43  ;;  %s1245_s25 = sld [smem:[#allocation2 + $0x8a]]  ;;  %v1260_v4 = vld [vmem:[#allocation5 + $0xd8] sm:$0xff] }
  0x4e   :  { %v177_v41 = vadd.f32 %v175_v11, %v168_v31  ;;  %v169_v11 = vadd.f32 %v167_v10, %v160_v52  ;;  %v494_v63 = vstv %s1191_s21  ;;  %v487_v25 = vmul.f32 %v486_v53, %v1124_v26  ;;  %s1258_s26 = sld [smem:[#allocation2 + $0x8b]] }
  0x4f   :  { %v465_v61 = vadd.f32 %v463_v35, %v457_v45  ;;  %v220_v20 = vmul.f32 %v219_v60, %v1236_v57  ;;  %v228_v24 = vstv %s1196_s22  ;;  %v448_v35 = vmul.f32 %v446_v13, %v1093_v9  ;;  %s1268_s27 = sld [smem:[#allocation2 + $0x8c]] }
  0x50   :  { %v186_v56 = vadd.f32 %v184_v18, %v177_v41  ;;  %v211_v18 = vmul.f32 %v210_v51, %v1230_v50  ;;  %v178_v10 = vadd.f32 %v176_v36, %v169_v11  ;;  %v502_v27 = vstv %s1207_s23  ;;  %s1281_s28 = sld [smem:[#allocation2 + $0x8d]] }
  0x51   :  { %v473_v19 = vadd.f32 %v471_v8, %v465_v61  ;;  %v495_v26 = vmul.f32 %v494_v63, %v1137_v33  ;;  %v203_v41 = vmul.f32 %v201_v34, %v1247_v15  ;;  %v510_v36 = vstv %s1219_s24  ;;  %v1270_v8 = vld [vmem:[#allocation5 + $0xe8] sm:$0xff]  ;;  %s1291_s29 = sld [smem:[#allocation2 + $0x8e]] }
  0x52   :  { %v195_v12 = vadd.f32 %v193_v6, %v186_v56  ;;  %v187_v6 = vadd.f32 %v185_v62, %v178_v10  ;;  %v503_v9 = vmul.f32 %v502_v27, %v1149_v40  ;;  %v212_v13 = vmul.f32 %v210_v51, %v1260_v4  ;;  %s1299_s30 = sld [smem:[#allocation2 + $0x8f]] }
  0x53   :  { %v481_v38 = vadd.f32 %v479_v14, %v473_v19  ;;  %v456_v34 = vmul.f32 %v454_v21, %v1105_v16  ;;  %v518_v56 = vstv %s1234_s4  ;;  %v1283_v14 = vld [vmem:[#allocation5 + $0xf8] sm:$0xff]  ;;  %v511_v11 = vmul.f32 %v510_v36, %v1164_v49 }
  0x54   :  { %v204_v31 = vadd.f32 %v202_v46, %v195_v12  ;;  %v229_v46 = vmul.f32 %v228_v24, %v1254_v59  ;;  %v196_v33 = vadd.f32 %v194_v7, %v187_v6  ;;  %v450_v40 = vadd.f32 %v448_v35, %v1129_v28 }
  0x55   :  { %v489_v52 = vadd.f32 %v487_v25, %v481_v38  ;;  %v221_v51 = vmul.f32 %v219_v60, %v1270_v8  ;;  %v526_v12 = vstv %s1245_s25  ;;  %v464_v21 = vmul.f32 %v462_v29, %v1118_v23 }
  0x56   :  { %v213_v45 = vadd.f32 %v211_v18, %v204_v31  ;;  %v205_v7 = vadd.f32 %v203_v41, %v196_v33  ;;  %v519_v19 = vmul.f32 %v518_v56, %v1172_v55  ;;  %v230_v49 = vmul.f32 %v228_v24, %v1283_v14 }
  0x57   :  { %v497_v62 = vadd.f32 %v495_v26, %v489_v52  ;;  %v534_v60 = vstv %s1258_s26  ;;  %v472_v25 = vmul.f32 %v470_v39, %v1131_v30  ;;  %v527_v23 = vmul.f32 %v526_v12, %v1178_v58 }
  0x58   :  { %v222_v61 = vadd.f32 %v220_v20, %v213_v45  ;;  %v214_v28 = vadd.f32 %v212_v13, %v205_v7  ;;  %v458_v29 = vadd.f32 %v456_v34, %v450_v40  ;;  %v542_v10 = vstv %s1268_s27  ;;  %v85_v40 = vld [vmem:[#allocation8 + $0x10] sm:$0xff] }
  0x59   :  { %v505_v18 = vadd.f32 %v503_v9, %v497_v62  ;;  %v480_v24 = vmul.f32 %v478_v5, %v1143_v37  ;;  %v535_v35 = vmul.f32 %v534_v60, %v1200_v22  ;;  %v550_v41 = vstv %s1281_s28 }
  0x5a   :  { %v231_v16 = vadd.f32 %v229_v46, %v222_v61  ;;  %v223_v55 = vadd.f32 %v221_v51, %v214_v28  ;;  %v466_v38 = vadd.f32 %v464_v21, %v458_v29  ;;  %v488_v30 = vmul.f32 %v486_v53, %v1154_v44  ;;  %v84_v51 = vld [vmem:[#allocation8 + $0x8] sm:$0xff] }
  0x5b   :  { %v513_v20 = vadd.f32 %v511_v11, %v505_v18  ;;  %v543_v58 = vmul.f32 %v542_v10, %v1209_v32  ;;  %v558_v45 = vstv %s1291_s29  ;;  %v496_v37 = vmul.f32 %v494_v63, %v1160_v47 }
  0x5c   :  { %852 = vmatprep.mubr.msk.f32.mxu0 %vm233_vm0, %v231_v16  ;;  %v232_v26 = vadd.f32 %v230_v49, %v223_v55  ;;  %v474_v6 = vadd.f32 %v472_v25, %v466_v38  ;;  %v551_v5 = vmul.f32 %v550_v41, %v1230_v50  ;;  %v566_v44 = vstv %s1299_s30 }
  0x5d   :  { %v521_v31 = vadd.f32 %v519_v19, %v513_v20  ;;  %v504_v32 = vmul.f32 %v502_v27, %v1162_v48  ;;  %v559_v52 = vmul.f32 %v558_v45, %v1236_v57  ;;  %v567_v50 = vmul.f32 %v566_v44, %v1254_v59 }
  0x5e   :  { %853 = vmatmul.mubr.msk.f32.vlgmr.msra.gmra.mxu0 %vm233_vm0, %v232_v26  ;;  %v482_v46 = vadd.f32 %v480_v24, %v474_v6  ;;  %v528_v27 = vmul.f32 %v526_v12, %v1221_v42  ;;  %v544_v59 = vmul.f32 %v542_v10, %v1247_v15  ;;  %v552_v34 = vmul.f32 %v550_v41, %v1260_v4  ;;  %v83_v15 = vld [vmem:[#allocation8] sm:$0xff] }
  0x5f   :  { %v529_v39 = vadd.f32 %v527_v23, %v521_v31  ;;  %867 = vmatpush3.msra.mxu0 %v1046_v0  ;;  %v512_v0 = vmul.f32 %v510_v36, %v1170_v54 }
  0x60   :  { %868 = vmatprep.subr.mxu0 %v1051_v1  ;;  %v490_v9 = vadd.f32 %v488_v30, %v482_v46 }
  0x61   :  { %v537_v22 = vadd.f32 %v535_v35, %v529_v39  ;;  %869 = vmatpush3.msra.mxu0 %v1051_v1  ;;  %v520_v1 = vmul.f32 %v518_v56, %v1193_v17  ;;  %v568_v56 = vmul.f32 %v566_v44, %v1283_v14 }
  0x62   :  { %870 = vmatprep.subr.mxu0 %v1062_v2  ;;  %v498_v63 = vadd.f32 %v496_v37, %v490_v9 }
  0x63   :  { %v545_v53 = vadd.f32 %v543_v58, %v537_v22  ;;  %871 = vmatpush3.msra.mxu0 %v1062_v2  ;;  %v536_v2 = vmul.f32 %v534_v60, %v1223_v43  ;;  %v86_v43 = vld [vmem:[#allocation8 + $0x18] sm:$0xff] }
  0x64   :  { %872 = vmatprep.subr.mxu0 %v1073_v3  ;;  %v506_v57 = vadd.f32 %v504_v32, %v498_v63  ;;  %855 = vmatprep.subr.mxu1 %v86_v43 }
  0x65   :  { %v553_v47 = vadd.f32 %v551_v5, %v545_v53  ;;  %873 = vmatpush3.msra.mxu0 %v1073_v3  ;;  %v560_v3 = vmul.f32 %v558_v45, %v1270_v8  ;;  %856 = vmatpush3.msra.mxu1 %v86_v43 }
  0x66   :  { %v514_v33 = vadd.f32 %v512_v0, %v506_v57  ;;  %857 = vmatprep.subr.mxu1 %v85_v40 }
  0x67   :  { %v561_v48 = vadd.f32 %v559_v52, %v553_v47  ;;  %858 = vmatpush3.msra.mxu1 %v85_v40  ;;  %v797_v52 = vld [vmem:[%s1395_s5] ss:$0 sm:$0xff] }
  0x68   :  { %v522_v54 = vadd.f32 %v520_v1, %v514_v33  ;;  %859 = vmatprep.subr.mxu1 %v84_v51 }
  0x69   :  { %v569_v13 = vadd.f32 %v567_v50, %v561_v48  ;;  %860 = vmatpush3.msra.mxu1 %v84_v51 }
  0x6a   :  { %v530_v36 = vadd.f32 %v528_v27, %v522_v54  ;;  %861 = vmatprep.subr.mxu1 %v83_v15 }
  0x6b   :  { %874 = vmatprep.mubr.msk.f32.mxu0 %vm233_vm0, %v569_v13  ;;  %862 = vmatpush3.msra.mxu1 %v83_v15 }
  0x6c   :  { %v538_v61 = vadd.f32 %v536_v2, %v530_v36  ;;  %877 = vmatprep.subr.mxu1 %v86_v43 }
  0x6e   :  { %v546_v17 = vadd.f32 %v544_v59, %v538_v61 }
  0x70   :  { %v554_v62 = vadd.f32 %v552_v34, %v546_v17 }
  0x72   :  { %v562_v42 = vadd.f32 %v560_v3, %v554_v62 }
  0x74   :  { %v570_v11 = vadd.f32 %v568_v56, %v562_v42 }
  0x76   :  { %875 = vmatmul.mubr.msk.f32.vlgmr.msra.gmra.mxu0 %vm233_vm0, %v570_v11 }
 0x11e   :  { %v854_v4 = vpop.f32.mrf.mxu0 }
 0x11f   :  { %v316_v14 = vrot.slane %v854_v4, 7  ;;  %v335_v7 = vrot.slane %v854_v4, 1 }
 0x120   :  { %v306_v8 = vpop.f32.mrf.mxu0 }
 0x121   :  { %v320_v12 = vrot.slane %v306_v8, 7  ;;  %v334_v16 = vrot.slane %v306_v8, 1  ;;  %325 = vrot.lane.b32.xlu0 %v306_v8, %s980_s8 }
 0x123   :  { %v336_v21 = vsel %vm333_vm1, %v334_v16, %v335_v7  ;;  %v324_v18 = vsel %vm319_vm2, %v316_v14, %v320_v12  ;;  %v321_v19 = vsel %vm319_vm2, %v320_v12, %v316_v14  ;;  %v339_v49 = vsel %vm333_vm1, %v335_v7, %v334_v16 }
 0x124   :  { %341 = vrot.lane.b32.xlu1 %v336_v21, %s981_s9 }
 0x125   :  { %327 = vrot.lane.b32.xlu0 %v854_v4, %s980_s8 }
 0x128   :  { %343 = vrot.lane.b32.xlu1 %v339_v49, %s981_s9 }
 0x136   :  { %v876_v28 = vpop.f32.mrf.mxu0 }
 0x137   :  { %v653_v60 = vrot.slane %v876_v28, 7  ;;  %v670_v25 = vrot.slane %v876_v28, 1  ;;  %663 = vrot.lane.b32.xlu1 %v876_v28, %s980_s8 }
 0x138   :  { %v643_v20 = vpop.f32.mrf.mxu0 }
 0x139   :  { %v656_v23 = vrot.slane %v643_v20, 7  ;;  %v669_v29 = vrot.slane %v643_v20, 1  ;;  %661 = vrot.lane.b32.xlu0 %v643_v20, %s980_s8 }
 0x13b   :  { %v671_v55 = vsel %vm333_vm1, %v669_v29, %v670_v25  ;;  %v674_v10 = vsel %vm333_vm1, %v670_v25, %v669_v29  ;;  %v660_v24 = vsel %vm319_vm2, %v653_v60, %v656_v23  ;;  %v657_v31 = vsel %vm319_vm2, %v656_v23, %v653_v60 }
 0x13c   :  { %678 = vrot.lane.b32.xlu1 %v674_v10, %s981_s9 }
 0x13d   :  { %676 = vrot.lane.b32.xlu0 %v671_v55, %s981_s9 }
 0x193   :  { %v326_v35 = vpop.permute.xlu0 %325 }
 0x194   :  { %v331_v38 = vadd.f32 %v326_v35, %v324_v18 }
 0x196   :  { %v342_v26 = vpop.permute.xlu1 %341 }
 0x197   :  { %v347_v41 = vadd.f32 %v342_v26, %v331_v38  ;;  %v328_v30 = vpop.permute.xlu0 %327 }
 0x198   :  { %v332_v39 = vadd.f32 %v328_v30, %v321_v19 }
 0x199   :  { %349 = vst.msk [vmem:[%s1396_s6] sm:$0xff] %vm233_vm0, %v347_v41  ;;  %863 = vmatprep.mubr.msk.f32.mxu1 %vm233_vm0, %v347_v41 }
 0x19a   :  { %v344_v58 = vpop.permute.xlu1 %343 }
 0x19b   :  { %v348_v6 = vadd.f32 %v344_v58, %v332_v39 }
 0x19d   :  { %350 = vst.msk [vmem:[%s1396_s6 + $0x8] sm:$0xff] %vm233_vm0, %v348_v6  ;;  %864 = vmatmul.mubr.msk.f32.vlgmr.msra.gmra.mxu1 %vm233_vm0, %v348_v6 }
 0x19e   :  { %878 = vmatpush3.msra.mxu1 %v86_v43 }
 0x19f   :  { %879 = vmatprep.subr.mxu1 %v85_v40 }
 0x1a0   :  { %880 = vmatpush3.msra.mxu1 %v85_v40 }
 0x1a1   :  { %881 = vmatprep.subr.mxu1 %v84_v51 }
 0x1a2   :  { %882 = vmatpush3.msra.mxu1 %v84_v51 }
 0x1a3   :  { %883 = vmatprep.subr.mxu1 %v83_v15 }
 0x1a4   :  { %884 = vmatpush3.msra.mxu1 %v83_v15 }
 0x1a9   :  { %v664_v45 = vpop.permute.xlu1 %663 }
 0x1aa   :  { %v668_v22 = vadd.f32 %v664_v45, %v657_v31 }
 0x1ab   :  { %v662_v37 = vpop.permute.xlu0 %661 }
 0x1ac   :  { %v667_v5 = vadd.f32 %v662_v37, %v660_v24 }
 0x1ae   :  { %v679_v46 = vpop.permute.xlu1 %678 }
 0x1af   :  { %v677_v44 = vpop.permute.xlu0 %676  ;;  %v683_v32 = vadd.f32 %v679_v46, %v668_v22 }
 0x1b0   :  { %v682_v53 = vadd.f32 %v677_v44, %v667_v5 }
 0x1b1   :  { %685 = vst.msk [vmem:[%s1396_s6 + $0x18] sm:$0xff] %vm233_vm0, %v683_v32 }
 0x1b2   :  { %684 = vst.msk [vmem:[%s1396_s6 + $0x10] sm:$0xff] %vm233_vm0, %v682_v53  ;;  %885 = vmatprep.mubr.msk.f32.mxu1 %vm233_vm0, %v682_v53 }
 0x1b3   :  { %886 = vmatmul.mubr.msk.f32.vlgmr.msra.gmra.mxu1 %vm233_vm0, %v683_v32 }
 0x25d   :  { %v865_v9 = vpop.f32.mrf.mxu1 }
 0x25e   :  { %v435_v0 = vadd.f32 %v865_v9, %v797_v52 }
 0x25f   :  { %v429_v47 = vpop.f32.mrf.mxu1 }
 0x260   :  { %440 = vst.msk [vmem:[%s1397_s7 + $0x8] sm:$0xff] %vm438_vm3, %v435_v0  ;;  %v430_v50 = vadd.f32 %v797_v52, %v429_v47 }
 0x262   :  { %439 = vst.msk [vmem:[%s1397_s7] sm:$0xff] %vm438_vm3, %v430_v50 }
 0x273   :  { %v887_v63 = vpop.f32.mrf.mxu1 }
 0x274   :  { %v764_v1 = vadd.f32 %v887_v63, %v797_v52 }
 0x275   :  { %v758_v48 = vpop.f32.mrf.mxu1 }
 0x276   :  { %768 = vst.msk [vmem:[%s1397_s7 + $0x18] sm:$0xff] %vm438_vm3, %v764_v1  ;;  %v759_v57 = vadd.f32 %v797_v52, %v758_v48 }
 0x278   :  { %767 = vst.msk [vmem:[%s1397_s7 + $0x10] sm:$0xff] %vm438_vm3, %v759_v57 }
 0x279   :  { %777 = vsyncpa [#allocation3], 1 }
 0x27a   :  { %778 = vsyncpa [#allocation7], 1 }
 0x27b   :  { %779 = vsyncpa [#allocation4], 1 }

// kernel: _lambda_.3
= control target key start
LH: loop header
LB: loop body
LE: loop exit
PB: predicated region body
PF: predicated region fallthrough
CT: control target
= control target key end

     0   :  { %vm114_vm0 = vcmask 261120   ;;  %vm755_vm1 = vcmask 1046528   ;;  %vm741_vm2 = vcmask 1040384   ;;  %vm1775_vm3 = vmmov 0   ;;  %s2285_s5 = inlined_call_operand.vmem [shape: f32[32,32], index: 5, kind: input, shape index: {}]   ;;  %s2286_s0 = inlined_call_operand.vmem [shape: f32[32,32], index: 0, kind: input, shape index: {}]   ;;  %s2287_s4 = inlined_call_operand.vmem [shape: f32[32,32], index: 4, kind: input, shape index: {}]   ;;  %s2288_s7 = inlined_call_operand.vmem [shape: f32[32,32], index: 7, kind: input, shape index: {}]   ;;  %s2289_s6 = inlined_call_operand.vmem [shape: f32[1,32], index: 6, kind: input, shape index: {}]   ;;  %s2290_s1 = inlined_call_operand.vmem [shape: f32[32,32], index: 1, kind: input, shape index: {}]   ;;  %s2291_s8 = inlined_call_operand.vmem [shape: f32[32,32], index: 8, kind: input, shape index: {}]   ;;  %s2292_s9 = inlined_call_operand.vmem [shape: f32[32,24], index: 9, kind: input, shape index: {}]   ;;  %s2293_s12 = inlined_call_operand.vmem [shape: f32[32,8], index: 12, kind: input, shape index: {}]   ;;  %s2294_s16 = inlined_call_operand.vmem [shape: f32[2,8], index: 16, kind: input, shape index: {}]   ;;  %s2295_s2 = inlined_call_operand.vmem [shape: f32[32,8], index: 2, kind: input, shape index: {}]   ;;  %s2296_s10 = inlined_call_operand.vmem [shape: f32[1,32], index: 10, kind: input, shape index: {}]   ;;  %s2297_s11 = inlined_call_operand.vmem [shape: f32[1,32], index: 11, kind: input, shape index: {}]   ;;  %s2298_s3 = inlined_call_operand.vmem [shape: f32[32,8], index: 3, kind: input, shape index: {}]   ;;  %s2299_s14 = inlined_call_operand.vmem [shape: f32[8,2], index: 14, kind: input, shape index: {}]   ;;  %s2300_s18 = inlined_call_operand.vmem [shape: f32[8,2], index: 18, kind: input, shape index: {}]   ;;  %s2301_s15 = inlined_call_operand.vmem [shape: f32[1,2], index: 15, kind: input, shape index: {}]   ;;  %s2302_s19 = inlined_call_operand.vmem [shape: f32[1,2], index: 19, kind: input, shape index: {}]   ;;  %s2303_s20 = inlined_call_operand.vmem [shape: f32[2,8], index: 20, kind: input, shape index: {}]   ;;  %s2304_s17 = inlined_call_operand.vmem [shape: f32[1,8], index: 17, kind: input, shape index: {}]   ;;  %s2305_s21 = inlined_call_operand.vmem [shape: f32[1,8], index: 21, kind: input, shape index: {}]   ;;  %s2306_s13 = inlined_call_operand.vmem [shape: f32[1,8], index: 13, kind: input, shape index: {}]   ;;  %s2307_s22 = inlined_call_operand.vmem [shape: f32[32,8], index: 22, kind: output, shape index: {}]  }
   0x1   :  { %2314 = sst [smem:[#allocation2_spill]] %s2285_s5  ;;  %v107_v45 = vld [vmem:[%s2292_s9 + $0x18] sm:$0xff]  ;;  %v106_v51 = vld [vmem:[%s2292_s9 + $0x10] sm:$0xff]  ;;  %v105_v54 = vld [vmem:[%s2292_s9 + $0x8] sm:$0xff]  ;;  %vm1199_vm4 = vcmask 1041408   ;;  %vm1083_vm5 = vcmask 64512  }
   0x2   :  { %2315 = sst [smem:[#allocation3_spill]] %s2286_s0  ;;  %v104_v56 = vld [vmem:[%s2292_s9] sm:$0xff]  ;;  %s1772_s9 = smov 120   ;;  %vm1195_vm6 = vcmask 15360  }
   0x3   :  { %2316 = sst [smem:[#allocation4_spill]] %s2287_s4 }
   0x4   :  { %2317 = sst [smem:[#allocation5_spill]] %s2288_s7 }
   0x5   :  { %2318 = sst [smem:[#allocation6_spill]] %s2289_s6 }
   0x6   :  { %2319 = sst [smem:[#allocation7_spill]] %s2290_s1 }
   0x7   :  { %2320 = sst [smem:[#allocation8_spill]] %s2291_s8 }
   0x8   :  { %s2321_s29 = sld [smem:[#allocation2_spill]] }
   0x9   :  { %s2322_s0 = sld [smem:[#allocation3_spill]] }
   0xa   :  { %s2323_s5 = sld [smem:[#allocation4_spill]] }
   0xb   :  { %s2324_s24 = sld [smem:[#allocation5_spill]] }
   0xc   :  { %s2325_s25 = sld [smem:[#allocation6_spill]] }
   0xd   :  { %s2326_s27 = sld [smem:[#allocation7_spill]] }
   0xe   :  { %v94_v0 = vld [vmem:[%s2321_s29 + $0x18] sm:$0xff]  ;;  %v93_v1 = vld [vmem:[%s2321_s29 + $0x10] sm:$0xff]  ;;  %v92_v3 = vld [vmem:[%s2321_s29 + $0x8] sm:$0xff]  ;;  %s2327_s1 = sld [smem:[#allocation8_spill]] }
   0xf   :  { %1628 = vmatprep.subr.mxu0 %v94_v0  ;;  %v71_v2 = vld [vmem:[%s2322_s0] sm:$0xff]  ;;  %v72_v5 = vld [vmem:[%s2322_s0 + $0x8] sm:$0xff]  ;;  %v73_v6 = vld [vmem:[%s2322_s0 + $0x10] sm:$0xff] }
  0x10   :  { %1629 = vmatpush3.msra.mxu0 %v94_v0  ;;  %1636 = vmatprep.mubr.msk.f32.mxu0 %vm114_vm0, %v71_v2  ;;  %v91_v4 = vld [vmem:[%s2321_s29] sm:$0xff]  ;;  %v74_v7 = vld [vmem:[%s2322_s0 + $0x18] sm:$0xff]  ;;  %v1947_v27 = vld [vmem:[%s2323_s5 + $0x8] sm:$0xff] }
  0x11   :  { %1630 = vmatprep.subr.mxu0 %v93_v1  ;;  %v1922_v8 = vld [vmem:[%s2323_s5] sm:$0xff]  ;;  %v99_v9 = vld [vmem:[%s2324_s24 + $0x18] sm:$0xff]  ;;  %v1952_v28 = vld [vmem:[%s2323_s5 + $0x10] sm:$0xff] }
  0x12   :  { %1631 = vmatpush3.msra.mxu0 %v93_v1  ;;  %1650 = vmatprep.mubr.msk.f32.mxu1 %vm114_vm0, %v1922_v8  ;;  %v1512_v12 = vld [vmem:[%s2325_s25] ss:$0 sm:$0xff]  ;;  %v1961_v29 = vld [vmem:[%s2323_s5 + $0x18] sm:$0xff]  ;;  %v98_v30 = vld [vmem:[%s2324_s24 + $0x10] sm:$0xff] }
  0x13   :  { %1632 = vmatprep.subr.mxu0 %v92_v3  ;;  %v78_v13 = vld [vmem:[%s2326_s27 + $0x18] sm:$0xff]  ;;  %v77_v16 = vld [vmem:[%s2326_s27 + $0x10] sm:$0xff]  ;;  %v76_v21 = vld [vmem:[%s2326_s27 + $0x8] sm:$0xff] }
  0x14   :  { %1633 = vmatpush3.msra.mxu0 %v92_v3  ;;  %v75_v24 = vld [vmem:[%s2326_s27] sm:$0xff]  ;;  %v97_v31 = vld [vmem:[%s2324_s24 + $0x8] sm:$0xff]  ;;  %v103_v33 = vld [vmem:[%s2327_s1 + $0x18] sm:$0xff] }
  0x15   :  { %1634 = vmatprep.subr.mxu0 %v91_v4  ;;  %v96_v32 = vld [vmem:[%s2324_s24] sm:$0xff]  ;;  %v102_v42 = vld [vmem:[%s2327_s1 + $0x10] sm:$0xff]  ;;  %v101_v43 = vld [vmem:[%s2327_s1 + $0x8] sm:$0xff] }
  0x16   :  { %1635 = vmatpush3.msra.mxu0 %v91_v4  ;;  %v100_v44 = vld [vmem:[%s2327_s1] sm:$0xff]  ;;  %s1773_s1 = smov 112  }
  0x17   :  { %1637 = vmatmul.mubr.msk.f32.vlgmr.msra.gmra.mxu0 %vm114_vm0, %v72_v5  ;;  %1656 = vmatprep.subr.mxu0 %v99_v9 }
  0x18   :  { %1639 = vmatprep.mubr.msk.f32.mxu0 %vm114_vm0, %v73_v6  ;;  %1657 = vmatpush3.msra.mxu0 %v99_v9 }
  0x19   :  { %1658 = vmatprep.subr.mxu0 %v98_v30 }
  0x1a   :  { %1659 = vmatpush3.msra.mxu0 %v98_v30 }
  0x1b   :  { %1640 = vmatmul.mubr.msk.f32.gmra.mxu0 %vm114_vm0, %v74_v7  ;;  %1660 = vmatprep.subr.mxu0 %v97_v31 }
  0x1c   :  { %1661 = vmatpush3.msra.mxu0 %v97_v31 }
  0x1d   :  { %1662 = vmatprep.subr.mxu0 %v96_v32 }
  0x1e   :  { %1663 = vmatpush3.msra.mxu0 %v96_v32 }
  0xd7   :  { %v1638_v10 = vpop.f32.mrf.mxu0 }
  0xd8   :  { %v199_v18 = vadd.f32 %v1638_v10, %v1512_v12 }
  0xd9   :  { %v193_v11 = vpop.f32.mrf.mxu0 }
  0xda   :  { %v194_v22 = vadd.f32 %v1512_v12, %v193_v11  ;;  %v213_v25 = vadd.f32 %v199_v18, %v76_v21 }
  0xdb   :  { %v1641_v14 = vpop.f32.mrf.mxu0 }
  0xdc   :  { %v209_v15 = vadd.f32 %v1641_v14, %v1512_v12  ;;  %v212_v26 = vadd.f32 %v194_v22, %v75_v24 }
  0xdd   :  { %v203_v17 = vpop.f32.mrf.mxu0 }
  0xde   :  { %v215_v19 = vadd.f32 %v209_v15, %v78_v13  ;;  %v204_v20 = vadd.f32 %v1512_v12, %v203_v17 }
  0xe0   :  { %v214_v23 = vadd.f32 %v204_v20, %v77_v16  ;;  %1642 = vmatprep.subr.mxu1 %v215_v19 }
  0xe1   :  { %1643 = vmatpush3.msra.mxu1 %v215_v19 }
  0xe2   :  { %1644 = vmatprep.subr.mxu1 %v214_v23 }
  0xe3   :  { %1645 = vmatpush3.msra.mxu1 %v214_v23 }
  0xe4   :  { %1646 = vmatprep.subr.mxu1 %v213_v25 }
  0xe5   :  { %1647 = vmatpush3.msra.mxu1 %v213_v25 }
  0xe6   :  { %1648 = vmatprep.subr.mxu1 %v212_v26 }
  0xe7   :  { %1649 = vmatpush3.msra.mxu1 %v212_v26 }
  0xe8   :  { %1651 = vmatmul.mubr.msk.f32.vlgmr.msra.gmra.mxu1 %vm114_vm0, %v1947_v27  ;;  %1670 = vmatprep.subr.mxu1 %v103_v33 }
  0xe9   :  { %1653 = vmatprep.mubr.msk.f32.mxu1 %vm114_vm0, %v1952_v28  ;;  %1671 = vmatpush3.msra.mxu1 %v103_v33 }
  0xea   :  { %1672 = vmatprep.subr.mxu1 %v102_v42 }
  0xeb   :  { %1673 = vmatpush3.msra.mxu1 %v102_v42 }
  0xec   :  { %1654 = vmatmul.mubr.msk.f32.gmra.mxu1 %vm114_vm0, %v1961_v29  ;;  %1674 = vmatprep.subr.mxu1 %v101_v43 }
  0xed   :  { %1675 = vmatpush3.msra.mxu1 %v101_v43 }
  0xee   :  { %1676 = vmatprep.subr.mxu1 %v100_v44 }
  0xef   :  { %1677 = vmatpush3.msra.mxu1 %v100_v44 }
  0xf0   :  { %1698 = vmatprep.subr.mxu1 %v107_v45 }
 0x1a8   :  { %v1652_v34 = vpop.f32.mrf.mxu1 }
 0x1a9   :  { %v314_v37 = vsub.f32 %v213_v25, %v1652_v34 }
 0x1aa   :  { %v294_v35 = vpop.f32.mrf.mxu1 }
 0x1ab   :  { %v313_v36 = vsub.f32 %v212_v26, %v294_v35 }
 0x1ac   :  { %v1655_v38 = vpop.f32.mrf.mxu1 }
 0x1ad   :  { %1664 = vmatprep.mubr.msk.f32.mxu0 %vm114_vm0, %v313_v36  ;;  %v316_v41 = vsub.f32 %v215_v19, %v1655_v38 }
 0x1ae   :  { %v304_v39 = vpop.f32.mrf.mxu1  ;;  %1665 = vmatmul.mubr.msk.f32.vlgmr.msra.gmra.mxu0 %vm114_vm0, %v314_v37 }
 0x1af   :  { %v315_v40 = vsub.f32 %v214_v23, %v304_v39 }
 0x1b1   :  { %1667 = vmatprep.mubr.msk.f32.mxu0 %vm114_vm0, %v315_v40 }
 0x1b2   :  { %1668 = vmatmul.mubr.msk.f32.gmra.mxu0 %vm114_vm0, %v316_v41 }
 0x1b3   :  { %1692 = vmatprep.mubr.msk.f32.mxu0 %vm114_vm0, %v1922_v8 }
 0x26e   :  { %v1666_v46 = vpop.f32.mrf.mxu0 }
 0x26f   :  { %v415_v49 = vmax.f32 %v1666_v46, 0.0 }
 0x270   :  { %v395_v47 = vpop.f32.mrf.mxu0 }
 0x271   :  { %v414_v48 = vmax.f32 %v395_v47, 0.0 }
 0x272   :  { %v1669_v50 = vpop.f32.mrf.mxu0 }
 0x273   :  { %1678 = vmatprep.mubr.msk.f32.mxu1 %vm114_vm0, %v414_v48  ;;  %v417_v55 = vmax.f32 %v1669_v50, 0.0 }
 0x274   :  { %v405_v52 = vpop.f32.mrf.mxu0  ;;  %1679 = vmatmul.mubr.msk.f32.vlgmr.msra.gmra.mxu1 %vm114_vm0, %v415_v49 }
 0x275   :  { %v416_v53 = vmax.f32 %v405_v52, 0.0  ;;  %1699 = vmatpush3.msra.mxu1 %v107_v45 }
 0x276   :  { %1700 = vmatprep.subr.mxu1 %v106_v51 }
 0x277   :  { %1681 = vmatprep.mubr.msk.f32.mxu1 %vm114_vm0, %v416_v53  ;;  %1701 = vmatpush3.msra.mxu1 %v106_v51  ;;  %v978_v53 = vld [vmem:[%s2293_s12 + $0x18] sm:$0xff] }
 0x278   :  { %1682 = vmatmul.mubr.msk.f32.gmra.mxu1 %vm114_vm0, %v417_v55  ;;  %1702 = vmatprep.subr.mxu1 %v105_v54 }
 0x279   :  { %1703 = vmatpush3.msra.mxu1 %v105_v54  ;;  %1706 = vmatprep.mubr.msk.f32.mxu1 %vm114_vm0, %v294_v35 }
 0x27a   :  { %1704 = vmatprep.subr.mxu1 %v104_v56 }
 0x27b   :  { %1705 = vmatpush3.msra.mxu1 %v104_v56 }
 0x27c   :  { %1707 = vmatmul.mubr.msk.f32.vlgmr.msra.gmra.mxu1 %vm114_vm0, %v1652_v34 }
 0x27d   :  { %1709 = vmatprep.mubr.msk.f32.mxu1 %vm114_vm0, %v304_v39 }
 0x280   :  { %1710 = vmatmul.mubr.msk.f32.gmra.mxu1 %vm114_vm0, %v1655_v38 }
 0x334   :  { %v1680_v57 = vpop.f32.mrf.mxu1 }
 0x335   :  { %v516_v63 = vadd.f32 %v1680_v57, %v314_v37  ;;  %v977_v57 = vld [vmem:[%s2293_s12 + $0x10] sm:$0xff] }
 0x336   :  { %v496_v58 = vpop.f32.mrf.mxu1 }
 0x337   :  { %v515_v0 = vadd.f32 %v496_v58, %v313_v36 }
 0x338   :  { %v1683_v59 = vpop.f32.mrf.mxu1 }
 0x339   :  { %v518_v60 = vadd.f32 %v1683_v59, %v316_v41 }
 0x33a   :  { %v506_v61 = vpop.f32.mrf.mxu1 }
 0x33b   :  { %v517_v62 = vadd.f32 %v506_v61, %v315_v40  ;;  %1684 = vmatprep.subr.mxu0 %v518_v60 }
 0x33c   :  { %1685 = vmatpush3.msra.mxu0 %v518_v60  ;;  %v2026_v13 = vpop.f32.mrf.mxu1 }
 0x33d   :  { %1686 = vmatprep.subr.mxu0 %v517_v62  ;;  %v757_v18 = vrot.slane %v2026_v13, 1 }
 0x33e   :  { %1687 = vmatpush3.msra.mxu0 %v517_v62  ;;  %v2028_v14 = vpop.f32.mrf.mxu1 }
 0x33f   :  { %1688 = vmatprep.subr.mxu0 %v516_v63  ;;  %v756_v16 = vrot.slane %v2028_v14, 1 }
 0x340   :  { %1689 = vmatpush3.msra.mxu0 %v516_v63  ;;  %v2030_v15 = vpop.f32.mrf.mxu1 }
 0x341   :  { %1690 = vmatprep.subr.mxu0 %v515_v0  ;;  %v758_v20 = vsel %vm755_vm1, %v756_v16, %v757_v18  ;;  %v791_v21 = vrot.slane %v2030_v15, 1  ;;  %v761_v23 = vsel %vm755_vm1, %v757_v18, %v756_v16 }
 0x342   :  { %1691 = vmatpush3.msra.mxu0 %v515_v0  ;;  %v2035_v17 = vpop.f32.mrf.mxu1 }
 0x343   :  { %1693 = vmatmul.mubr.msk.f32.vlgmr.msra.gmra.mxu0 %vm114_vm0, %v1947_v27  ;;  %v790_v19 = vrot.slane %v2035_v17, 1  ;;  %1718 = vmatprep.subr.mxu0 %v978_v53 }
 0x344   :  { %1695 = vmatprep.mubr.msk.f32.mxu0 %vm114_vm0, %v1952_v28  ;;  %1719 = vmatpush3.msra.mxu0 %v978_v53 }
 0x345   :  { %v792_v22 = vsel %vm755_vm1, %v790_v19, %v791_v21  ;;  %v795_v24 = vsel %vm755_vm1, %v791_v21, %v790_v19  ;;  %1720 = vmatprep.subr.mxu0 %v977_v57 }
 0x346   :  { %1721 = vmatpush3.msra.mxu0 %v977_v57 }
 0x347   :  { %1696 = vmatmul.mubr.msk.f32.gmra.mxu0 %vm114_vm0, %v1961_v29 }
 0x403   :  { %v1694_v1 = vpop.f32.mrf.mxu0 }
 0x404   :  { %v605_v5 = vsub.f32 %v516_v63, %v1694_v1 }
 0x405   :  { %v585_v2 = vpop.f32.mrf.mxu0 }
 0x406   :  { %1712 = vmatprep.mubr.msk.f32.mxu1 %vm114_vm0, %v585_v2  ;;  %v604_v3 = vsub.f32 %v515_v0, %v585_v2  ;;  %v878_v11 = vsel %vm114_vm0, %v605_v5, 0.0  ;;  %v1107_v2 = vld [vmem:[%s2294_s16] sm:$0x3] }
 0x407   :  { %v1697_v4 = vpop.f32.mrf.mxu0  ;;  %1713 = vmatmul.mubr.msk.f32.gmra.mxu1 %vm114_vm0, %v1694_v1  ;;  %v1774_v1 = vmov 0.0  }
 0x408   :  { %v875_v6 = vsel %vm114_vm0, %v604_v3, 0.0  ;;  %v607_v7 = vsub.f32 %v518_v60, %v1697_v4  ;;  %v976_v60 = vld [vmem:[%s2293_s12 + $0x8] sm:$0xff]  ;;  %1737 = vmatprep.subr.mxu1 %v1774_v1 }
 0x409   :  { %876 = vadd.xlane.f32.xlu0 %v875_v6  ;;  %v595_v8 = vpop.f32.mrf.mxu0  ;;  %1722 = vmatprep.subr.mxu0 %v976_v60 }
 0x40a   :  { %v606_v9 = vsub.f32 %v517_v62, %v595_v8  ;;  %1715 = vmatprep.mubr.msk.f32.mxu1 %vm114_vm0, %v595_v8  ;;  %v884_v10 = vsel %vm114_vm0, %v607_v7, 0.0  ;;  %v975_v62 = vld [vmem:[%s2293_s12] sm:$0xff]  ;;  %1723 = vmatpush3.msra.mxu0 %v976_v60 }
 0x40b   :  { %885 = vadd.xlane.f32.xlu1 %v884_v10  ;;  %1716 = vmatmul.mubr.msk.f32.gmra.mxu1 %vm114_vm0, %v1697_v4 }
 0x40c   :  { %v881_v12 = vsel %vm114_vm0, %v606_v9, 0.0  ;;  %1724 = vmatprep.subr.mxu0 %v975_v62  ;;  %1739 = vmatprep.mubr.msk.f32.mxu1 %vm1775_vm3, %v1774_v1 }
 0x40d   :  { %879 = vadd.xlane.f32.xlu0 %v878_v11  ;;  %1725 = vmatpush3.msra.mxu0 %v975_v62 }
 0x40e   :  { %1732 = vmatprep.subr.mxu0 %v1774_v1  ;;  %1738 = vmatpush3.msk.msra.mxu1 %vm1199_vm4, %v1107_v2 }
 0x40f   :  { %882 = vadd.xlane.f32.xlu1 %v881_v12  ;;  %1747 = vmatprep.subr.mxu1 %v1774_v1 }
 0x420   :  { %749 = vrot.lane.b32.xlu1 %v2026_v13, %s1772_s9 }
 0x423   :  { %747 = vrot.lane.b32.xlu0 %v2028_v14, %s1772_s9 }
 0x424   :  { %782 = vrot.lane.b32.xlu1 %v2035_v17, %s1772_s9 }
 0x427   :  { %763 = vrot.lane.b32.xlu0 %v758_v20, %s1773_s1  ;;  %v777_v20 = vrot.slane %v2035_v17, 7 }
 0x428   :  { %784 = vrot.lane.b32.xlu1 %v2030_v15, %s1772_s9 }
 0x42b   :  { %797 = vrot.lane.b32.xlu0 %v792_v22, %s1773_s1 }
 0x42c   :  { %765 = vrot.lane.b32.xlu1 %v761_v23, %s1773_s1 }
 0x430   :  { %799 = vrot.lane.b32.xlu1 %v795_v24, %s1773_s1  ;;  %v774_v24 = vrot.slane %v2030_v15, 7 }
 0x492   :  { %v877_v25 = vpop.xlane.xlu0 %876 }
 0x493   :  { %v888_v26 = vmul.f32 0.03125, %v877_v25 }
 0x494   :  { %v886_v27 = vpop.xlane.xlu1 %885 }
 0x495   :  { %v2054_v28 = vsub.f32 %v604_v3, %v888_v26  ;;  %v891_v29 = vmul.f32 0.03125, %v886_v27  ;;  %v742_v26 = vrot.slane %v2028_v14, 7  ;;  %v82_v14 = vld [vmem:[%s2295_s2 + $0x18] sm:$0xff] }
 0x496   :  { %v880_v30 = vpop.xlane.xlu0 %879 }
 0x497   :  { %v889_v31 = vmul.f32 0.03125, %v880_v30  ;;  %v896_v32 = vmul.f32 %v2054_v28, %v2054_v28  ;;  %v2058_v34 = vsub.f32 %v607_v7, %v891_v29  ;;  %v738_v30 = vrot.slane %v2026_v13, 7 }
 0x498   :  { %v883_v33 = vpop.xlane.xlu1 %882 }
 0x499   :  { %v2060_v35 = vsub.f32 %v605_v5, %v889_v31  ;;  %v890_v36 = vmul.f32 0.03125, %v883_v33  ;;  %v900_v37 = vsel %vm114_vm0, %v896_v32, 0.0  ;;  %v899_v42 = vmul.f32 %v2058_v34, %v2058_v34 }
 0x49a   :  { %901 = vadd.xlane.f32.xlu0 %v900_v37  ;;  %v748_v5 = vpop.permute.xlu0 %747  ;;  %v781_v31 = vsel %vm741_vm2, %v774_v24, %v777_v20  ;;  %v778_v32 = vsel %vm741_vm2, %v777_v20, %v774_v24  ;;  %v743_v37 = vsel %vm741_vm2, %v742_v26, %v738_v30 }
 0x49b   :  { %v2063_v38 = vsub.f32 %v606_v9, %v890_v36  ;;  %v897_v39 = vmul.f32 %v2060_v35, %v2060_v35  ;;  %v909_v44 = vsel %vm114_vm0, %v899_v42, 0.0  ;;  %v81_v42 = vld [vmem:[%s2295_s2 + $0x10] sm:$0xff] }
 0x49c   :  { %v750_v3 = vpop.permute.xlu1 %749 }
 0x49d   :  { %v903_v40 = vsel %vm114_vm0, %v897_v39, 0.0  ;;  %v898_v41 = vmul.f32 %v2063_v38, %v2063_v38  ;;  %v754_v15 = vadd.f32 %v750_v3, %v743_v37 }
 0x49e   :  { %904 = vadd.xlane.f32.xlu1 %v903_v40  ;;  %v764_v7 = vpop.permute.xlu0 %763  ;;  %v746_v40 = vsel %vm741_vm2, %v738_v30, %v742_v26 }
 0x49f   :  { %v906_v43 = vsel %vm114_vm0, %v898_v41, 0.0  ;;  %v753_v41 = vadd.f32 %v748_v5, %v746_v40 }
 0x4a0   :  { %907 = vadd.xlane.f32.xlu0 %v906_v43  ;;  %v783_v4 = vpop.permute.xlu1 %782 }
 0x4a1   :  { %v788_v33 = vadd.f32 %v783_v4, %v781_v31 }
 0x4a2   :  { %910 = vadd.xlane.f32.xlu1 %v909_v44  ;;  %v798_v9 = vpop.permute.xlu0 %797  ;;  %v80_v44 = vld [vmem:[%s2295_s2 + $0x8] sm:$0xff] }
 0x4a3   :  { %v803_v13 = vadd.f32 %v798_v9, %v788_v33 }
 0x4a4   :  { %v785_v6 = vpop.permute.xlu1 %784 }
 0x4a5   :  { %v789_v36 = vadd.f32 %v785_v6, %v778_v32 }
 0x4a8   :  { %v766_v8 = vpop.permute.xlu1 %765 }
 0x4a9   :  { %v770_v43 = vadd.f32 %v766_v8, %v754_v15 }
 0x4ab   :  { %v2149_v53 = vadd.f32 %v770_v43, %v80_v44  ;;  %v86_v43 = vld [vmem:[%s2298_s3 + $0x18] sm:$0xff] }
 0x4ac   :  { %v800_v10 = vpop.permute.xlu1 %799 }
 0x4ad   :  { %v804_v39 = vadd.f32 %v800_v10, %v789_v36  ;;  %v1085_v2 = vsel %vm1083_vm5, %v2149_v53, 0.0 }
 0x4c7   :  { %v1714_v45 = vpop.f32.mrf.mxu1 }
 0x4c8   :  { %818 = vrot.lane.b32.xlu1 %v1714_v45, %s1772_s9  ;;  %v825_v47 = vrot.slane %v1714_v45, 1  ;;  %v808_v50 = vrot.slane %v1714_v45, 7  ;;  %v2138_v45 = vadd.f32 %v804_v39, %v82_v14 }
 0x4c9   :  { %v718_v46 = vpop.f32.mrf.mxu1 }
 0x4ca   :  { %v811_v48 = vrot.slane %v718_v46, 7  ;;  %v824_v49 = vrot.slane %v718_v46, 1  ;;  %816 = vrot.lane.b32.xlu0 %v718_v46, %s1772_s9  ;;  %v1095_v57 = vsel %vm1083_vm5, %v2138_v45, 0.0 }
 0x4cb   :  { %v2076_v51 = vpop.f32.mrf.mxu1 }
 0x4cc   :  { %852 = vrot.lane.b32.xlu1 %v2076_v51, %s1772_s9  ;;  %v826_v52 = vsel %vm755_vm1, %v824_v49, %v825_v47  ;;  %v2087_v55 = vsel %vm741_vm2, %v811_v48, %v808_v50  ;;  %v2090_v56 = vsel %vm741_vm2, %v808_v50, %v811_v48  ;;  %v829_v59 = vsel %vm755_vm1, %v825_v47, %v824_v49  ;;  %v1541_v48 = vld [vmem:[%s2296_s10] ss:$0 sm:$0xff] }
 0x4cd   :  { %v2084_v54 = vpop.f32.mrf.mxu1  ;;  %v859_v61 = vrot.slane %v2076_v51, 1  ;;  %v769_v47 = vadd.f32 %v764_v7, %v753_v41  ;;  %v79_v49 = vld [vmem:[%s2295_s2] sm:$0xff]  ;;  %v2146_v50 = vadd.f32 %v803_v13, %v81_v42 }
 0x4ce   :  { %831 = vrot.lane.b32.xlu0 %v826_v52, %s1773_s1  ;;  %v858_v58 = vrot.slane %v2084_v54, 1  ;;  %v845_v20 = vrot.slane %v2084_v54, 7 }
 0x4cf   :  { %v2153_v60 = vadd.f32 %v769_v47, %v79_v49  ;;  %v1094_v62 = vsel %vm1083_vm5, %v2146_v50, 0.0 }
 0x4d0   :  { %833 = vrot.lane.b32.xlu1 %v829_v59, %s1773_s1  ;;  %v863_v63 = vsel %vm755_vm1, %v859_v61, %v858_v58  ;;  %v860_v0 = vsel %vm755_vm1, %v858_v58, %v859_v61  ;;  %v1542_v61 = vld [vmem:[%s2297_s11] ss:$0 sm:$0xff]  ;;  %v1096_v3 = vadd.f32 %v1095_v57, %v1094_v62 }
 0x4d1   :  { %v1084_v9 = vsel %vm1083_vm5, %v2153_v60, 0.0 }
 0x4d2   :  { %850 = vrot.lane.b32.xlu0 %v2084_v54, %s1772_s9  ;;  %v1086_v10 = vadd.f32 %v1085_v2, %v1084_v9  ;;  %v842_v54 = vrot.slane %v2076_v51, 7 }
 0x4d4   :  { %867 = vrot.lane.b32.xlu1 %v863_v63, %s1773_s1  ;;  %v849_v42 = vsel %vm741_vm2, %v842_v54, %v845_v20 }
 0x4d6   :  { %865 = vrot.lane.b32.xlu0 %v860_v0, %s1773_s1 }
 0x523   :  { %v902_v11 = vpop.xlane.xlu0 %901 }
 0x524   :  { %v912_v12 = vmul.f32 0.03125, %v902_v11 }
 0x526   :  { %v916_v16 = vadd.f32 1e-05, %v912_v12 }
 0x527   :  { %v905_v18 = vpop.xlane.xlu1 %904 }
 0x528   :  { %1756 = vrsqrt.f32 %v916_v16  ;;  %v913_v19 = vmul.f32 0.03125, %v905_v18  ;;  %v1097_v18 = vrot.slane %v1096_v3, 4 }
 0x529   :  { %v908_v21 = vpop.xlane.xlu0 %907 }
 0x52a   :  { %v917_v22 = vadd.f32 1e-05, %v913_v19  ;;  %v914_v23 = vmul.f32 0.03125, %v908_v21 }
 0x52b   :  { %v911_v25 = vpop.xlane.xlu1 %910 }
 0x52c   :  { %1758 = vrsqrt.f32 %v917_v22  ;;  %v918_v27 = vadd.f32 1e-05, %v914_v23  ;;  %v915_v29 = vmul.f32 0.03125, %v911_v25 }
 0x52e   :  { %1760 = vrsqrt.f32 %v918_v27  ;;  %v919_v17 = vadd.f32 1e-05, %v915_v29  ;;  %v84_v29 = vld [vmem:[%s2298_s3 + $0x8] sm:$0xff] }
 0x530   :  { %1762 = vrsqrt.f32 %v919_v17  ;;  %v1098_v17 = vadd.f32 %v1097_v18, %v1096_v3 }
 0x532   :  { %v1099_v57 = vrot.slane %v1098_v17, 2 }
 0x535   :  { %v1757_v46 = vpop.eup %1756 }
 0x536   :  { %v924_v52 = vmul.f32 %v1757_v46, %v2054_v28 }
 0x538   :  { %v935_v58 = vmul.f32 %v1541_v48, %v924_v52 }
 0x539   :  { %v1759_v59 = vpop.eup %1758 }
 0x53a   :  { %v925_v63 = vmul.f32 %v1759_v59, %v2060_v35  ;;  %v819_v28 = vpop.permute.xlu1 %818  ;;  %v2163_v6 = vadd.f32 %v1542_v61, %v935_v58  ;;  %v85_v59 = vld [vmem:[%s2298_s3 + $0x10] sm:$0xff] }
 0x53b   :  { %v1761_v0 = vpop.eup %1760  ;;  %v823_v24 = vadd.f32 %v819_v28, %v2087_v55  ;;  %v846_v55 = vsel %vm741_vm2, %v845_v20, %v842_v54 }
 0x53c   :  { %v817_v4 = vpop.permute.xlu0 %816  ;;  %v936_v5 = vmul.f32 %v1541_v48, %v925_v63  ;;  %v926_v7 = vmul.f32 %v1761_v0, %v2063_v38  ;;  %v83_v38 = vld [vmem:[%s2298_s3] sm:$0xff]  ;;  %v950_v22 = vsel %vm114_vm0, %v2163_v6, 0.0 }
 0x53d   :  { %v1763_v8 = vpop.eup %1762  ;;  %v822_v19 = vadd.f32 %v817_v4, %v2090_v56  ;;  %v1087_v56 = vrot.slane %v1086_v10, 4 }
 0x53e   :  { %v927_v11 = vmul.f32 %v1763_v8, %v2058_v34  ;;  %v853_v35 = vpop.permute.xlu1 %852  ;;  %v2169_v12 = vadd.f32 %v1542_v61, %v936_v5  ;;  %v937_v16 = vmul.f32 %v1541_v48, %v926_v7  ;;  %v1100_v8 = vadd.f32 %v1099_v57, %v1098_v17 }
 0x53f   :  { %v857_v15 = vadd.f32 %v853_v35, %v846_v55  ;;  %v1088_v13 = vadd.f32 %v1087_v56, %v1086_v10 }
 0x540   :  { %v832_v21 = vpop.permute.xlu0 %831  ;;  %v951_v34 = vsel %vm114_vm0, %v2169_v12, 0.0  ;;  %v938_v23 = vmul.f32 %v1541_v48, %v927_v11  ;;  %v2181_v27 = vadd.f32 %v1542_v61, %v937_v16 }
 0x541   :  { %v837_v25 = vadd.f32 %v832_v21, %v822_v19  ;;  %v952_v26 = vadd.f32 %v951_v34, %v950_v22  ;;  %v1089_v2 = vrot.slane %v1088_v13, 2  ;;  %v1101_v22 = vrot.slane %v1100_v8, 1 }
 0x542   :  { %v834_v30 = vpop.permute.xlu1 %833  ;;  %v2187_v31 = vadd.f32 %v1542_v61, %v938_v23  ;;  %v963_v40 = vsel %vm114_vm0, %v2181_v27, 0.0 }
 0x543   :  { %v2189_v32 = vadd.f32 %v837_v25, %v83_v38  ;;  %v838_v33 = vadd.f32 %v834_v30, %v823_v24  ;;  %v953_v36 = vrot.slane %v952_v26, 4  ;;  %v1090_v18 = vadd.f32 %v1089_v2, %v1088_v13 }
 0x544   :  { %v851_v37 = vpop.permute.xlu0 %850  ;;  %v964_v39 = vsel %vm114_vm0, %v2187_v31, 0.0 }
 0x545   :  { %v2194_v51 = vadd.f32 %v838_v33, %v84_v29  ;;  %v954_v14 = vadd.f32 %v953_v36, %v952_v26  ;;  %v1279_v41 = vsel %vm1083_vm5, %v2189_v32, 0.0  ;;  %v965_v46 = vadd.f32 %v964_v39, %v963_v40  ;;  %v1105_v29 = vld [vmem:[%s2299_s14] sm:$0xff] }
 0x546   :  { %v868_v44 = vpop.permute.xlu1 %867  ;;  %v856_v48 = vadd.f32 %v851_v37, %v849_v42  ;;  %v1091_v56 = vrot.slane %v1090_v18, 1  ;;  %v1102_v33 = vadd.f32 %v1101_v22, %v1100_v8  ;;  %v1472_v22 = vlaneseq }
 0x547   :  { %v1280_v47 = vsel %vm1083_vm5, %v2194_v51, 0.0  ;;  %v872_v49 = vadd.f32 %v868_v44, %v857_v15  ;;  %v955_v52 = vrot.slane %v954_v14, 2  ;;  %v966_v62 = vrot.slane %v965_v46, 4 }
 0x548   :  { %v1281_v58 = vadd.f32 %v1280_v47, %v1279_v41  ;;  %v866_v61 = vpop.permute.xlu0 %865  ;;  %v1092_v37 = vadd.f32 %v1091_v56, %v1090_v18  ;;  %v1103_v15 = vmul.f32 0.0625, %v1102_v33 }
 0x549   :  { %v2209_v63 = vadd.f32 %v872_v49, %v86_v43  ;;  %v871_v28 = vadd.f32 %v866_v61, %v856_v48  ;;  %v956_v0 = vadd.f32 %v955_v52, %v954_v14  ;;  %v967_v4 = vadd.f32 %v966_v62, %v965_v46  ;;  %v1548_v52 = vld [vmem:[%s2301_s15] ss:$0 sm:$0xff] }
 0x54a   :  { %v1282_v3 = vrot.slane %v1281_v58, 4  ;;  %v1093_v13 = vmul.f32 0.0625, %v1092_v37  ;;  %v1554_v61 = vld [vmem:[%s2302_s19] ss:$0 sm:$0xff] }
 0x54b   :  { %v2211_v5 = vadd.f32 %v871_v28, %v85_v59  ;;  %v957_v7 = vrot.slane %v956_v0, 1  ;;  %v968_v10 = vrot.slane %v967_v4, 2  ;;  %v1290_v11 = vsel %vm1083_vm5, %v2209_v63, 0.0  ;;  %v1302_v28 = vld [vmem:[%s2303_s20] sm:$0x3] }
 0x54c   :  { %v1283_v9 = vadd.f32 %v1282_v3, %v1281_v58 }
 0x54d   :  { %v1289_v35 = vsel %vm1083_vm5, %v2211_v5, 0.0  ;;  %v958_v16 = vadd.f32 %v957_v7, %v956_v0  ;;  %v969_v38 = vadd.f32 %v968_v10, %v967_v4  ;;  %v1550_v7 = vld [vmem:[%s2304_s17] ss:$0 sm:$0xff] }
 0x54e   :  { %v1284_v19 = vrot.slane %v1283_v9, 2  ;;  %v1291_v20 = vadd.f32 %v1290_v11, %v1289_v35  ;;  %v1556_v11 = vld [vmem:[%s2305_s21] ss:$0 sm:$0xff] }
 0x54f   :  { %v960_v21 = vmul.f32 0.0625, %v958_v16  ;;  %v970_v24 = vrot.slane %v969_v38, 1 }
 0x550   :  { %v1285_v34 = vadd.f32 %v1284_v19, %v1283_v9  ;;  %v1292_v23 = vrot.slane %v1291_v20, 4 }
 0x551   :  { %v961_v25 = vsub.f32 %v2163_v6, %v960_v21  ;;  %v962_v26 = vsub.f32 %v2169_v12, %v960_v21  ;;  %v971_v30 = vadd.f32 %v970_v24, %v969_v38 }
 0x552   :  { %v1293_v54 = vadd.f32 %v1292_v23, %v1291_v20  ;;  %v1286_v36 = vrot.slane %v1285_v34, 1  ;;  %v1473_v23 = vshrl.u32 %v1472_v22, 7 }
 0x553   :  { %1726 = vmatprep.mubr.msk.f32.mxu0 %vm114_vm0, %v961_v25  ;;  %v972_v55 = vmul.f32 0.0625, %v971_v30 }
 0x554   :  { %v1294_v17 = vrot.slane %v1293_v54, 2  ;;  %1727 = vmatmul.mubr.msk.f32.vlgmr.msra.gmra.mxu0 %vm114_vm0, %v962_v26  ;;  %v1287_v40 = vadd.f32 %v1286_v36, %v1285_v34  ;;  %v1474_v24 = vsub.s32 0, %v1473_v23  ;;  %v1490_v25 = vsub.s32 1, %v1473_v23 }
 0x555   :  { %1733 = vmatpush3.msra.mxu0 %v1105_v29  ;;  %v973_v12 = vsub.f32 %v2181_v27, %v972_v55  ;;  %v974_v39 = vsub.f32 %v2187_v31, %v972_v55  ;;  %v1300_v27 = vld [vmem:[%s2300_s18] sm:$0xff]  ;;  %v1104_v31 = vsel %vm741_vm2, %v1093_v13, %v1103_v15 }
 0x556   :  { %v1295_v6 = vadd.f32 %v1294_v17, %v1293_v54  ;;  %1742 = vmatprep.subr.mxu0 %v1774_v1  ;;  %v1288_v42 = vmul.f32 0.0625, %v1287_v40  ;;  %v1543_v29 = vld [vmem:[%s2306_s13] ss:$0 sm:$0xff] }
 0x557   :  { %1729 = vmatprep.mubr.msk.f32.mxu0 %vm114_vm0, %v973_v12 }
 0x558   :  { %v1296_v14 = vrot.slane %v1295_v6, 1  ;;  %1730 = vmatmul.mubr.msk.f32.gmra.mxu0 %vm114_vm0, %v974_v39 }
 0x559   :  { %1734 = vmatprep.mubr.msk.f32.mxu0 %vm1775_vm3, %v1774_v1 }
 0x55a   :  { %v1297_v41 = vadd.f32 %v1296_v14, %v1295_v6 }
 0x55c   :  { %v1298_v43 = vmul.f32 0.0625, %v1297_v41  ;;  %1735 = vmatmul.mubr.msk.f32.vlgmr.msra.gmra.mxu0 %vm1083_vm5, %v1104_v31 }
 0x55d   :  { %1743 = vmatpush3.msra.mxu0 %v1300_v27  ;;  %1744 = vmatprep.mubr.msk.f32.mxu0 %vm1775_vm3, %v1774_v1 }
 0x55e   :  { %v1299_v44 = vsel %vm741_vm2, %v1288_v42, %v1298_v43 }
 0x560   :  { %1745 = vmatmul.mubr.msk.f32.vlgmr.msra.gmra.mxu0 %vm1083_vm5, %v1299_v44 }
 0x614   :  { %v1728_v46 = vpop.f32.mrf.mxu0 }
 0x615   :  { %v1070_v37 = vadd.f32 %v1728_v46, %v1543_v29 }
 0x616   :  { %v1064_v47 = vpop.f32.mrf.mxu0 }
 0x617   :  { %v1065_v6 = vadd.f32 %v1543_v29, %v1064_v47 }
 0x618   :  { %v1731_v48 = vpop.f32.mrf.mxu0 }
 0x619   :  { %v1080_v12 = vadd.f32 %v1731_v48, %v1543_v29 }
 0x61a   :  { %v1074_v49 = vpop.f32.mrf.mxu0 }
 0x61b   :  { %v1075_v39 = vadd.f32 %v1543_v29, %v1074_v49 }
 0x61c   :  { %v1184_v57 = vpop.f32.mrf.mxu0 }
 0x61d   :  { %v1185_v58 = vadd.f32 %v1548_v52, %v1184_v57 }
 0x61e   :  { %v1736_v59 = vpop.f32.mrf.mxu0 }
 0x61f   :  { %v1188_v62 = vmax.f32 %v1185_v58, 0.0 }
 0x620   :  { %v1379_v0 = vpop.f32.mrf.mxu0 }
 0x621   :  { %v1380_v2 = vadd.f32 %v1554_v61, %v1379_v0  ;;  %1740 = vmatmul.mubr.msk.f32.vlgmr.msra.gmra.mxu1 %vm1195_vm6, %v1188_v62 }
 0x622   :  { %v1746_v3 = vpop.f32.mrf.mxu0  ;;  %1748 = vmatpush3.msk.msra.mxu1 %vm1199_vm4, %v1302_v28  ;;  %1749 = vmatprep.mubr.msk.f32.mxu1 %vm1775_vm3, %v1774_v1 }
 0x623   :  { %v1383_v4 = vmax.f32 %v1380_v2, 0.0 }
 0x625   :  { %1750 = vmatmul.mubr.msk.f32.vlgmr.msra.gmra.mxu1 %vm1195_vm6, %v1383_v4 }
 0x6e1   :  { %v1269_v8 = vpop.f32.mrf.mxu1 }
 0x6e2   :  { %v1270_v9 = vadd.f32 %v1550_v7, %v1269_v8 }
 0x6e3   :  { %v1741_v10 = vpop.f32.mrf.mxu1 }
 0x6e4   :  { %v1553_v35 = vmul.f32 -1.442695, %v1270_v9 }
 0x6e5   :  { %v1462_v16 = vpop.f32.mrf.mxu1 }
 0x6e6   :  { %1764 = vpow2.f32 %v1553_v35  ;;  %v1463_v18 = vadd.f32 %v1556_v11, %v1462_v16 }
 0x6e7   :  { %v1751_v19 = vpop.f32.mrf.mxu1 }
 0x6e8   :  { %v1559_v20 = vmul.f32 -1.442695, %v1463_v18 }
 0x6ea   :  { %1766 = vpow2.f32 %v1559_v20 }
 0x6f3   :  { %v1765_v1 = vpop.eup %1764 }
 0x6f4   :  { %v1276_v38 = vadd.f32 1.0, %v1765_v1 }
 0x6f6   :  { %1768 = vrcp.f32 %v1276_v38 }
 0x6f7   :  { %v1767_v21 = vpop.eup %1766 }
 0x6f8   :  { %v1469_v34 = vadd.f32 1.0, %v1767_v21 }
 0x6fa   :  { %1770 = vrcp.f32 %v1469_v34 }
 0x703   :  { %v1769_v26 = vpop.eup %1768 }
 0x704   :  { %v1475_v56 = vrot.slane %v1769_v26, %v1474_v24  ;;  %v1491_v54 = vrot.slane %v1769_v26, %v1490_v25 }
 0x706   :  { %v1476_v30 = vmul.f32 %v1475_v56, %v2153_v60  ;;  %v1477_v33 = vmul.f32 %v1475_v56, %v2149_v53  ;;  %v1492_v36 = vmul.f32 %v1491_v54, %v2146_v50  ;;  %v1493_v17 = vmul.f32 %v1491_v54, %v2138_v45 }
 0x707   :  { %v1771_v55 = vpop.eup %1770 }
 0x708   :  { %v1483_v15 = vrot.slane %v1771_v55, %v1474_v24  ;;  %v1499_v14 = vrot.slane %v1771_v55, %v1490_v25  ;;  %v1478_v40 = vadd.f32 %v1476_v30, %v1065_v6  ;;  %v1479_v13 = vadd.f32 %v1477_v33, %v1070_v37 }
 0x709   :  { %v1494_v41 = vadd.f32 %v1492_v36, %v1075_v39  ;;  %v1495_v27 = vadd.f32 %v1493_v17, %v1080_v12 }
 0x70a   :  { %v1484_v31 = vmul.f32 %v1483_v15, %v2189_v32  ;;  %v1485_v60 = vmul.f32 %v1483_v15, %v2194_v51  ;;  %v1500_v53 = vmul.f32 %v1499_v14, %v2211_v5  ;;  %v1501_v50 = vmul.f32 %v1499_v14, %v2209_v63 }
 0x70c   :  { %v1486_v45 = vadd.f32 %v1484_v31, %v1478_v40  ;;  %v1487_v42 = vadd.f32 %v1485_v60, %v1479_v13  ;;  %v1502_v43 = vadd.f32 %v1500_v53, %v1494_v41  ;;  %v1503_v44 = vadd.f32 %v1501_v50, %v1495_v27 }
 0x70e   :  { %1504 = vst.msk [vmem:[%s2307_s22] sm:$0xff] %vm1083_vm5, %v1486_v45  ;;  %1505 = vst.msk [vmem:[%s2307_s22 + $0x8] sm:$0xff] %vm1083_vm5, %v1487_v42 }
 0x70f   :  { %1506 = vst.msk [vmem:[%s2307_s22 + $0x10] sm:$0xff] %vm1083_vm5, %v1502_v43  ;;  %1507 = vst.msk [vmem:[%s2307_s22 + $0x18] sm:$0xff] %vm1083_vm5, %v1503_v44 }

</bundles_post_ra>
